<compile_context>
chip_gen: v5e
topology: v5e:2x2
jax: 0.10.0
libtpu: 0.0.40
codegen_flags: <defaults>
</compile_context>

<pallas_src>
import jax
import jax.numpy as jnp
from jax.experimental import pallas as pl
from jax.experimental.pallas import tpu as pltpu


def _round_up(n, m):
    return ((n + m - 1) // m) * m


def _cdiv(a, b):
    return -(-a // b)


def _mlp_kernel(x_ref, w1_ref, b1_ref, w2_ref, b2_ref, w3_ref, b3_ref,
                o_ref, acc_ref):
    k = pl.program_id(1)

    @pl.when(k == 0)
    def _():
        acc_ref[...] = jnp.zeros_like(acc_ref)

    # Layer 1: cast x to bf16 in-kernel (VPU), MXU matmul, f32 accumulate.
    xb = x_ref[...].astype(jnp.bfloat16)
    acc_ref[...] += jnp.dot(xb, w1_ref[...], preferred_element_type=jnp.float32)

    @pl.when(k == pl.num_programs(1) - 1)
    def _():
        # Layer 1 epilogue: bias + ReLU.
        h1 = jnp.maximum(acc_ref[...] + b1_ref[...], 0.0)
        # Layer 2: bf16 MXU matmul, f32 accumulate, bias + ReLU.
        h2 = jnp.dot(h1.astype(jnp.bfloat16), w2_ref[...],
                     preferred_element_type=jnp.float32)
        h2 = jnp.maximum(h2 + b2_ref[...], 0.0)
        # Layer 3 (out_features == 1): VPU multiply + cross-lane (XLU) reduce
        # instead of a lane-padded (512, 1) MXU matmul.
        logits = jnp.sum(h2 * w3_ref[...], axis=-1, keepdims=True)
        o_ref[...] = (logits + b3_ref[0]).astype(o_ref.dtype)


def _choose_tiles(B, in_dim, h1_dim, h2_dim):
    """Pick (b_pad, tm, n_bt, tk, n_k) under a conservative VMEM budget."""
    b8 = _round_up(max(B, 1), 8)

    # Batch tiling: cap rows per tile at 512, force >=2 tiles when there is
    # enough batch so the "parallel" axis shards across both v7x TensorCores,
    # and balance tile size so padding waste is at most one sublane group.
    tm_cap = 512
    n_bt = max(_cdiv(b8, tm_cap), 2 if b8 >= 16 else 1)
    tm = _round_up(_cdiv(b8, n_bt), 8)
    n_bt = _cdiv(b8, tm)
    b_pad = n_bt * tm

    # Conservative budget: fits the 16 MiB v5e default scoped VMEM with room
    # for compiler temps; also safe for v6e/v7x (32 MiB scoped default).
    budget = 12 * 1024 * 1024
    fixed = h1_dim * h2_dim * 2 + (h1_dim + 2 * h2_dim) * 4   # w2 + b1 + b2 + w3
    per_row = h1_dim * 4 + h1_dim * 4 + h2_dim * 4 + 8        # acc + h1/h2 temps + out(x2)

    def fits(tk, n_k):
        x_bytes = tm * tk * 4 * 2                              # f32 x tile, double-buffered
        w1_bytes = tk * h1_dim * 2 * (2 if n_k > 1 else 1)     # bf16 w1 tile
        return fixed + tm * per_row + x_bytes + w1_bytes <= budget

    if fits(in_dim, 1):
        tk, n_k = in_dim, 1
    else:
        # K-tile layer 1 over in_dim with MXU-friendly tile sizes.
        tk, n_k = in_dim, 1  # fallback if no clean divisor (see TODO below)
        for cand in (4096, 2048, 1024, 512, 256, 128):
            if in_dim % cand == 0 and fits(cand, in_dim // cand):
                tk, n_k = cand, in_dim // cand
                break
    # TODO(synk): if in_dim is huge and has no 128-multiple divisor we fall
    # back to a single K tile and rely on an explicit vmem_limit_bytes bump.
    est = (fixed + tm * per_row + tm * tk * 4 * 2
           + tk * h1_dim * 2 * (2 if n_k > 1 else 1))
    return b_pad, tm, n_bt, tk, n_k, est


def neural_network_forward(x_nchw, params):
    """x_nchw: (B, C, H, W) float32.  Returns logits (B, 1) float32."""
    w1, b1, w2, b2, w3_row, b3 = params
    B = x_nchw.shape[0]

    # nn.Flatten(): row-major flatten of all dims after batch (plain-JAX glue).
    # Keep f32: the bf16 cast happens inside the kernel (halves HBM passes).
    x = x_nchw.reshape(B, -1)

    in_dim = x.shape[1]
    h1_dim = w1.shape[1]
    h2_dim = w2.shape[1]
    out_dim = 1

    # Explicit shape validation (clear errors instead of opaque trace failures).
    assert w1.shape[0] == in_dim, (w1.shape, in_dim)
    assert b1.shape == (1, h1_dim), b1.shape
    assert w2.shape[0] == h1_dim, (w2.shape, h1_dim)
    assert b2.shape == (1, h2_dim), b2.shape
    assert w3_row.shape == (1, h2_dim), w3_row.shape
    assert b3.shape == (1,), b3.shape

    b_pad, tm, n_bt, tk, n_k, vmem_est = _choose_tiles(B, in_dim, h1_dim, h2_dim)
    if b_pad != B:
        x = jnp.pad(x, ((0, b_pad - B), (0, 0)))

    const = lambda i, k: (0, 0)  # resident weight/bias blocks

    # w1: K-tiled when n_k > 1 (needs double buffering); otherwise resident
    # and single-buffered like the other weights.
    if n_k > 1:
        w1_spec = pl.BlockSpec((tk, h1_dim), lambda i, k: (k, 0))
    else:
        w1_spec = pl.BlockSpec((tk, h1_dim), const, pipeline_mode=pl.Buffered(1))

    flops = 2 * b_pad * (in_dim * h1_dim + h1_dim * h2_dim + h2_dim)
    bytes_accessed = (
        x.size * 4
        + w1.size * w1.dtype.itemsize + w2.size * w2.dtype.itemsize
        + w3_row.size * 4 + b1.size * 4 + b2.size * 4 + b3.size * 4
        + b_pad * out_dim * 4
    )

    compiler_kwargs = {"dimension_semantics": ("parallel", "arbitrary")}
    if vmem_est > 12 * 1024 * 1024:
        compiler_kwargs["vmem_limit_bytes"] = int(vmem_est * 1.25) + (2 << 20)

    out_pad = pl.pallas_call(
        _mlp_kernel,
        out_shape=jax.ShapeDtypeStruct((b_pad, out_dim), jnp.float32),
        grid=(n_bt, n_k),
        in_specs=[
            pl.BlockSpec((tm, tk), lambda i, k: (i, k)),            # x (f32, tiled)
            w1_spec,                                                # w1 (bf16)
            pl.BlockSpec((1, h1_dim), const,
                         pipeline_mode=pl.Buffered(1)),             # b1
            pl.BlockSpec((h1_dim, h2_dim), const,
                         pipeline_mode=pl.Buffered(1)),             # w2 (resident)
            pl.BlockSpec((1, h2_dim), const,
                         pipeline_mode=pl.Buffered(1)),             # b2
            pl.BlockSpec((1, h2_dim), const,
                         pipeline_mode=pl.Buffered(1)),             # w3 as a row
            pl.BlockSpec(memory_space=pltpu.MemorySpace.SMEM),      # b3 scalar
        ],
        out_specs=pl.BlockSpec((tm, out_dim), lambda i, k: (i, 0)),
        scratch_shapes=[pltpu.VMEM((tm, h1_dim), jnp.float32)],     # layer-1 acc
        compiler_params=pltpu.CompilerParams(**compiler_kwargs),
        cost_estimate=pl.CostEstimate(
            flops=flops, transcendentals=0, bytes_accessed=bytes_accessed),
    )(x, w1, b1, w2, b2, w3_row, b3)

    return out_pad[:B]


def init_params(key, input_size, input_count):
    """Deterministic synthetic parameters matching the module's layer shapes.

    PyTorch Linear stores weight as (out, in); we store (in, out), with the
    two big matmul weights in bf16 (MXU-native) and the final layer as a
    (1, 512) f32 row used by the in-kernel VPU reduction.
    """
    k1, k2, k3, k4, k5, k6 = jax.random.split(key, 6)
    scale1 = 1.0 / jnp.sqrt(input_size)
    scale2 = 1.0 / jnp.sqrt(512.0)
    w1 = jax.random.uniform(k1, (input_size, input_count), jnp.float32,
                            -scale1, scale1).astype(jnp.bfloat16)
    b1 = jax.random.uniform(k2, (1, input_count), jnp.float32, -scale1, scale1)
    w2 = jax.random.uniform(k3, (512, 512), jnp.float32,
                            -scale2, scale2).astype(jnp.bfloat16)
    b2 = jax.random.uniform(k4, (1, 512), jnp.float32, -scale2, scale2)
    w3_row = jax.random.uniform(k5, (1, 512), jnp.float32, -scale2, scale2)
    b3 = jax.random.uniform(k6, (1,), jnp.float32, -scale2, scale2)
    return (w1, b1, w2, b2, w3_row, b3)


def reference_forward(x_nchw, params):
    """Plain-JAX reference with the same bf16-weight / f32-accumulate recipe."""
    w1, b1, w2, b2, w3_row, b3 = params
    x = x_nchw.reshape(x_nchw.shape[0], -1)
    h1 = jnp.maximum(
        jnp.dot(x.astype(jnp.bfloat16), w1,
                preferred_element_type=jnp.float32) + b1, 0.0)
    h2 = jnp.maximum(
        jnp.dot(h1.astype(jnp.bfloat16), w2,
                preferred_element_type=jnp.float32) + b2, 0.0)
    logits = jnp.sum(h2 * w3_row, axis=-1, keepdims=True) + b3[0]
    return logits


if __name__ == "__main__":
    # Small shapes: batch=2, channels=4, spatial=8x8 -> input_size = 4*8*8 = 256
    B, C, H, W = 2, 4, 8, 8
    input_size = C * H * W
    input_count = 512  # must be 512 to feed the declared Linear(512, 512)

    key = jax.random.PRNGKey(0)
    kx, kp = jax.random.split(key)
    x = jax.random.normal(kx, (B, C, H, W), jnp.float32)
    params = init_params(kp, input_size, input_count)

    logits = neural_network_forward(x, params)
    logits = jax.block_until_ready(logits)

    ref = reference_forward(x, params)
    assert logits.shape == (B, 1), logits.shape
    assert jnp.allclose(logits, ref, atol=5e-3, rtol=5e-3), "mismatch vs reference"

    print("KERNEL_OK")
</pallas_src>

<mosaic_0001>
module attributes {stable_mosaic.version = 11 : i64} {
  func.func @_mlp_kernel(%arg0: i32, %arg1: i32, %arg2: memref<8x256xf32, #tpu.memory_space<vmem>>, %arg3: memref<256x512xbf16, #tpu.memory_space<vmem>>, %arg4: memref<1x512xf32, #tpu.memory_space<vmem>>, %arg5: memref<512x512xbf16, #tpu.memory_space<vmem>>, %arg6: memref<1x512xf32, #tpu.memory_space<vmem>>, %arg7: memref<1x512xf32, #tpu.memory_space<vmem>>, %arg8: memref<1xf32, #tpu.memory_space<smem>>, %arg9: memref<8x1xf32, #tpu.memory_space<vmem>>, %arg10: memref<8x512xf32, #tpu.memory_space<vmem>>) attributes {dimension_semantics = [#tpu.dimension_semantics<parallel>, #tpu.dimension_semantics<arbitrary>], iteration_bounds = array<i64: 1, 1>, scalar_prefetch = 0 : i64, scratch_operands = 1 : i64, tpu.core_type = #tpu.core_type<tc>, window_params = [{transform_indices = @transform_0, window_bounds = array<i64: 8, 256>}, {pipeline_mode = #tpu.pipeline_mode<synchronous>, transform_indices = @transform_1, window_bounds = array<i64: 256, 512>}, {pipeline_mode = #tpu.pipeline_mode<synchronous>, transform_indices = @transform_2, window_bounds = array<i64: 1, 512>}, {pipeline_mode = #tpu.pipeline_mode<synchronous>, transform_indices = @transform_3, window_bounds = array<i64: 512, 512>}, {pipeline_mode = #tpu.pipeline_mode<synchronous>, transform_indices = @transform_4, window_bounds = array<i64: 1, 512>}, {pipeline_mode = #tpu.pipeline_mode<synchronous>, transform_indices = @transform_5, window_bounds = array<i64: 1, 512>}, {transform_indices = @transform_6, window_bounds = array<i64: 1>}, {transform_indices = @transform_7, window_bounds = array<i64: 8, 1>}]} {
    %c0_i32 = arith.constant 0 : i32
    %0 = arith.cmpi eq, %arg1, %c0_i32 : i32
    %1 = arith.extui %0 : i1 to i32
    %c0_i32_0 = arith.constant 0 : i32
    %2 = arith.cmpi ne, %1, %c0_i32_0 : i32
    scf.if %2 {
      %cst_10 = arith.constant 0.000000e+00 : f32
      %13 = vector.broadcast %cst_10 : f32 to vector<8x512xf32>
      %c0_11 = arith.constant 0 : index
      %c0_12 = arith.constant 0 : index
      %14 = vector.load %arg10[%c0_11, %c0_12] : memref<8x512xf32, #tpu.memory_space<vmem>>, vector<8x512xf32>
      tpu.vector_store %arg10[%c0_11, %c0_12], %13 {strides = array<i32>} : memref<8x512xf32, #tpu.memory_space<vmem>>, vector<8x512xf32>,
    } else {
    }
    %c0 = arith.constant 0 : index
    %c0_1 = arith.constant 0 : index
    %3 = vector.load %arg2[%c0, %c0_1] : memref<8x256xf32, #tpu.memory_space<vmem>>, vector<8x256xf32>
    %4 = arith.truncf %3 : vector<8x256xf32> to vector<8x256xbf16>
    %c0_2 = arith.constant 0 : index
    %c0_3 = arith.constant 0 : index
    %5 = vector.load %arg10[%c0_2, %c0_3] : memref<8x512xf32, #tpu.memory_space<vmem>>, vector<8x512xf32>
    %c0_4 = arith.constant 0 : index
    %c0_5 = arith.constant 0 : index
    %6 = vector.load %arg3[%c0_4, %c0_5] : memref<256x512xbf16, #tpu.memory_space<vmem>>, vector<256x512xbf16>
    %cst = arith.constant dense<0.000000e+00> : vector<8x512xf32>
    %7 = tpu.matmul %4, %6, %cst {dimension_numbers = #tpu.dot_dimension_numbers<[1], [0], [0], [1], [0, 0, 1, 1], [], []>} : vector<8x256xbf16>, vector<256x512xbf16>, vector<8x512xf32> -> vector<8x512xf32>
    %8 = arith.addf %5, %7 : vector<8x512xf32>
    %c0_6 = arith.constant 0 : index
    %c0_7 = arith.constant 0 : index
    %9 = vector.load %arg10[%c0_6, %c0_7] : memref<8x512xf32, #tpu.memory_space<vmem>>, vector<8x512xf32>
    tpu.vector_store %arg10[%c0_6, %c0_7], %8 {strides = array<i32>} : memref<8x512xf32, #tpu.memory_space<vmem>>, vector<8x512xf32>,
    %c0_i32_8 = arith.constant 0 : i32
    %10 = arith.cmpi eq, %arg1, %c0_i32_8 : i32
    %11 = arith.extui %10 : i1 to i32
    %c0_i32_9 = arith.constant 0 : i32
    %12 = arith.cmpi ne, %11, %c0_i32_9 : i32
    scf.if %12 {
      %c0_10 = arith.constant 0 : index
      %c0_11 = arith.constant 0 : index
      %13 = vector.load %arg10[%c0_10, %c0_11] : memref<8x512xf32, #tpu.memory_space<vmem>>, vector<8x512xf32>
      %c0_12 = arith.constant 0 : index
      %c0_13 = arith.constant 0 : index
      %14 = vector.load %arg4[%c0_12, %c0_13] : memref<1x512xf32, #tpu.memory_space<vmem>>, vector<1x512xf32>
      %15 = vector.broadcast %14 : vector<1x512xf32> to vector<8x512xf32>
      %16 = arith.addf %13, %15 : vector<8x512xf32>
      %cst_14 = arith.constant 0.000000e+00 : f32
      %17 = vector.broadcast %cst_14 : f32 to vector<8x512xf32>
      %18 = arith.maximumf %16, %17 : vector<8x512xf32>
      %19 = arith.truncf %18 : vector<8x512xf32> to vector<8x512xbf16>
      %c0_15 = arith.constant 0 : index
      %c0_16 = arith.constant 0 : index
      %20 = vector.load %arg5[%c0_15, %c0_16] : memref<512x512xbf16, #tpu.memory_space<vmem>>, vector<512x512xbf16>
      %cst_17 = arith.constant dense<0.000000e+00> : vector<8x512xf32>
      %21 = tpu.matmul %19, %20, %cst_17 {dimension_numbers = #tpu.dot_dimension_numbers<[1], [0], [0], [1], [0, 0, 1, 1], [], []>} : vector<8x512xbf16>, vector<512x512xbf16>, vector<8x512xf32> -> vector<8x512xf32>
      %c0_18 = arith.constant 0 : index
      %c0_19 = arith.constant 0 : index
      %22 = vector.load %arg6[%c0_18, %c0_19] : memref<1x512xf32, #tpu.memory_space<vmem>>, vector<1x512xf32>
      %23 = vector.broadcast %22 : vector<1x512xf32> to vector<8x512xf32>
      %24 = arith.addf %21, %23 : vector<8x512xf32>
      %cst_20 = arith.constant 0.000000e+00 : f32
      %25 = vector.broadcast %cst_20 : f32 to vector<8x512xf32>
      %26 = arith.maximumf %24, %25 : vector<8x512xf32>
      %c0_21 = arith.constant 0 : index
      %c0_22 = arith.constant 0 : index
      %27 = vector.load %arg7[%c0_21, %c0_22] : memref<1x512xf32, #tpu.memory_space<vmem>>, vector<1x512xf32>
      %28 = vector.broadcast %27 : vector<1x512xf32> to vector<8x512xf32>
      %29 = arith.mulf %26, %28 : vector<8x512xf32>
      %cst_23 = arith.constant dense<0.000000e+00> : vector<8xf32>
      %30 = vector.multi_reduction <add>, %29, %cst_23 [1] : vector<8x512xf32> to vector<8xf32>
      %31 = vector.shape_cast %30 : vector<8xf32> to vector<8x1xf32>
      %c0_24 = arith.constant 0 : index
      %32 = memref.load %arg8[%c0_24] : memref<1xf32, #tpu.memory_space<smem>>
      %33 = vector.broadcast %32 : f32 to vector<8x1xf32>
      %34 = arith.addf %31, %33 : vector<8x1xf32>
      %c0_25 = arith.constant 0 : index
      %c0_26 = arith.constant 0 : index
      %35 = vector.load %arg9[%c0_25, %c0_26] : memref<8x1xf32, #tpu.memory_space<vmem>>, vector<8x1xf32>
      tpu.vector_store %arg9[%c0_25, %c0_26], %34 {strides = array<i32>} : memref<8x1xf32, #tpu.memory_space<vmem>>, vector<8x1xf32>,
    } else {
    }
    return
  }
  func.func @transform_0(%arg0: i32, %arg1: i32) -> (i32, i32) {
    %c0_i32 = arith.constant 0 : i32
    return %arg0, %arg1 : i32, i32
  }
  func.func @transform_1(%arg0: i32, %arg1: i32) -> (i32, i32) {
    %c0_i32 = arith.constant 0 : i32
    %c0_i32_0 = arith.constant 0 : i32
    %c0_i32_1 = arith.constant 0 : i32
    return %c0_i32, %c0_i32_0 : i32, i32
  }
  func.func @transform_2(%arg0: i32, %arg1: i32) -> (i32, i32) {
    %c0_i32 = arith.constant 0 : i32
    %c0_i32_0 = arith.constant 0 : i32
    %c0_i32_1 = arith.constant 0 : i32
    return %c0_i32, %c0_i32_0 : i32, i32
  }
  func.func @transform_3(%arg0: i32, %arg1: i32) -> (i32, i32) {
    %c0_i32 = arith.constant 0 : i32
    %c0_i32_0 = arith.constant 0 : i32
    %c0_i32_1 = arith.constant 0 : i32
    return %c0_i32, %c0_i32_0 : i32, i32
  }
  func.func @transform_4(%arg0: i32, %arg1: i32) -> (i32, i32) {
    %c0_i32 = arith.constant 0 : i32
    %c0_i32_0 = arith.constant 0 : i32
    %c0_i32_1 = arith.constant 0 : i32
    return %c0_i32, %c0_i32_0 : i32, i32
  }
  func.func @transform_5(%arg0: i32, %arg1: i32) -> (i32, i32) {
    %c0_i32 = arith.constant 0 : i32
    %c0_i32_0 = arith.constant 0 : i32
    %c0_i32_1 = arith.constant 0 : i32
    return %c0_i32, %c0_i32_0 : i32, i32
  }
  func.func @transform_6(%arg0: i32, %arg1: i32) -> i32 {
    %c0_i32 = arith.constant 0 : i32
    %c0_i32_0 = arith.constant 0 : i32
    return %c0_i32 : i32
  }
  func.func @transform_7(%arg0: i32, %arg1: i32) -> (i32, i32) {
    %c0_i32 = arith.constant 0 : i32
    %c0_i32_0 = arith.constant 0 : i32
    return %arg0, %c0_i32 : i32, i32
  }
}

</mosaic_0001>

<bundles_post_ra>
// kernel: tpu_custom_call.1
= control target key start
LH: loop header
LB: loop body
LE: loop exit
PB: predicated region body
PF: predicated region fallthrough
CT: control target
= control target key end

     0   :  { %13 = vsyncpa [#allocation5], 0  ;;  %s2867_s0 = inlined_call_operand.hbm [shape: f32[8,256], index: 0, kind: input, shape index: {}]   ;;  %s2868_s1 = inlined_call_operand.hbm [shape: bf16[256,512], index: 1, kind: input, shape index: {}]   ;;  %s2869_s2 = inlined_call_operand.hbm [shape: f32[1,512], index: 2, kind: input, shape index: {}]   ;;  %s2870_s3 = inlined_call_operand.hbm [shape: bf16[512,512], index: 3, kind: input, shape index: {}]   ;;  %s2871_s4 = inlined_call_operand.vmem [shape: f32[1,512], index: 4, kind: input, shape index: {}]   ;;  %s2872_s5 = inlined_call_operand.hbm [shape: f32[1,512], index: 5, kind: input, shape index: {}]   ;;  %s2873_s6 = inlined_call_operand.<no memory space> [shape: f32[1], index: 6, kind: input, shape index: {}]   ;;  %s2874_s7 = inlined_call_operand.vmem [shape: f32[8,1], index: 7, kind: output, shape index: {}]  }
   0x1   :  { %14 = vsyncpa [#allocation7], 0  ;;  %s31_s26 = sshll.u32 %s2868_s1, 4  ;;  %s32_s26 = int_to_ptr.hbm [resolvable:$true] %s31_s26 }
   0x2   :  { %15 = vsyncpa [#allocation10], 0  ;;  %s2754_s27 = smov [#allocation6]   ;;  %s55_s8 = sshll.u32 %s2870_s3, 4  ;;  %s56_s8 = int_to_ptr.hbm [resolvable:$true] %s55_s8 }
   0x3   :  { %s33_s28 = sshll.u32 %s2754_s27, 4  ;;  %s2755_s9 = smov 256   ;;  %s34_s28 = int_to_ptr.vmem [resolvable:$true] %s33_s28 }
   0x4   :  { %s2756_s10 = smov 16   ;;  %s2757_s11 = smov [#allocation9]  }
   0x5   :  { %39 = dma.hbm_to_vmem [thread:$0]  %s32_s26, 8192, %s34_s28, [#allocation7], %s2755_s9, %s2755_s9, %s2756_s10  }
   0x6   :  { %s57_s12 = sshll.u32 %s2757_s11, 4  ;;  %s21_s15 = sshll.u32 %s2867_s0, 4  ;;  %s58_s12 = int_to_ptr.vmem [resolvable:$true] %s57_s12  ;;  %s22_s15 = int_to_ptr.hbm [resolvable:$true] %s21_s15 }
   0x7   :  { %63 = dma.hbm_to_vmem [thread:$0]  %s56_s8, 16384, %s58_s12, [#allocation10], %s2755_s9, %s2755_s9, %s2756_s10  }
   0x8   :  { %s45_s17 = sshll.u32 %s2869_s2, 4  ;;  %s2758_s18 = smov [#allocation4]   ;;  %s46_s17 = int_to_ptr.hbm [resolvable:$true] %s45_s17 }
   0x9   :  { %s23_s19 = sshll.u32 %s2758_s18, 4  ;;  %s2759_s3 = smov [#allocation8]   ;;  %s24_s19 = int_to_ptr.vmem [resolvable:$true] %s23_s19 }
   0xa   :  { %26 = dma.hbm_to_vmem [thread:$0]  %s22_s15, 256, %s24_s19, [#allocation5]  }
   0xb   :  { %s47_s20 = sshll.u32 %s2759_s3, 4  ;;  %s71_s23 = sshll.u32 %s2872_s5, 4  ;;  %s48_s20 = int_to_ptr.vmem [resolvable:$true] %s47_s20  ;;  %s72_s23 = int_to_ptr.hbm [resolvable:$true] %s71_s23 }
   0xc   :  { %50 = dma.hbm_to_vmem [thread:$0]  %s46_s17, 64, %s48_s20, [#allocation7]  }
   0xd   :  { %s2760_s0 = smov [#allocation11]  }
   0xe   :  { %s73_s24 = sshll.u32 %s2760_s0, 4  ;;  %s74_s24 = int_to_ptr.vmem [resolvable:$true] %s73_s24 }
   0xf   :  { %76 = dma.hbm_to_vmem [thread:$0]  %s72_s23, 64, %s74_s24, [#allocation10]  }
  0x10   :  { %2748 = dma.done.wait [#allocation5], 256  }
  0x11   :  { %2749 = vsyncadd [#allocation5], 4294967040 }
  0x12   :  { %2750 = dma.done.wait [#allocation7], 8256  }
  0x13   :  { %2751 = vsyncadd [#allocation7], 4294959040 }
  0x14   :  { %2752 = dma.done.wait [#allocation10], 16448  }
  0x15   :  { %2753 = vsyncadd [#allocation10], 4294950848  ;;  %v1775_v0 = vld [vmem:[#allocation6 + $0xe0] sm:$0xf]  ;;  %v2459_v1 = vld [vmem:[#allocation6 + $0xec] sm:$0xf0] }
  0x16   :  { %v1903_v2 = vld [vmem:[#allocation6 + $0x1e0] sm:$0xf]  ;;  %v1776_v3 = vor.u32 %v2459_v1, %v1775_v0  ;;  %v2491_v4 = vld [vmem:[#allocation6 + $0x1ec] sm:$0xf0]  ;;  %v2457_v5 = vld [vmem:[#allocation6 + $0xe4] sm:$0xf] }
  0x17   :  { %v1777_v6 = vld [vmem:[#allocation6 + $0xf0] sm:$0xf0]  ;;  %v1904_v7 = vor.u32 %v2491_v4, %v1903_v2  ;;  %v2489_v9 = vld [vmem:[#allocation6 + $0x1e4] sm:$0xf]  ;;  %v1759_v11 = vld [vmem:[#allocation6 + $0xc0] sm:$0xf] }
  0x18   :  { %v1780_v8 = vor.u32 %v2457_v5, %v1777_v6  ;;  %v1905_v10 = vld [vmem:[#allocation6 + $0x1f0] sm:$0xf0]  ;;  %499 = vmatpush.bf16.msra.mxu0 %v1776_v3  ;;  %v2455_v13 = vld [vmem:[#allocation6 + $0xcc] sm:$0xf0]  ;;  %v1887_v14 = vld [vmem:[#allocation6 + $0x1c0] sm:$0xf] }
  0x19   :  { %v1908_v12 = vor.u32 %v2489_v9, %v1905_v10  ;;  %v2487_v15 = vld [vmem:[#allocation6 + $0x1cc] sm:$0xf0]  ;;  %512 = vmatpush.bf16.msra.mxu1 %v1904_v7  ;;  %v1760_v16 = vor.u32 %v2455_v13, %v1759_v11  ;;  %v2453_v18 = vld [vmem:[#allocation6 + $0xc4] sm:$0xf]  ;;  %v1761_v19 = vld [vmem:[#allocation6 + $0xd0] sm:$0xf0] }
  0x1a   :  { %525 = vmatpush.bf16.msra.mxu2 %v1780_v8  ;;  %v1888_v17 = vor.u32 %v2487_v15, %v1887_v14  ;;  %v2485_v20 = vld [vmem:[#allocation6 + $0x1c4] sm:$0xf]  ;;  %v1764_v21 = vor.u32 %v2453_v18, %v1761_v19  ;;  %v1889_v22 = vld [vmem:[#allocation6 + $0x1d0] sm:$0xf0]  ;;  %v1743_v23 = vld [vmem:[#allocation6 + $0xa0] sm:$0xf] }
  0x1b   :  { %538 = vmatpush.bf16.msra.mxu3 %v1908_v12  ;;  %v2451_v24 = vld [vmem:[#allocation6 + $0xac] sm:$0xf0]  ;;  %v1892_v25 = vor.u32 %v2485_v20, %v1889_v22  ;;  %v1871_v26 = vld [vmem:[#allocation6 + $0x1a0] sm:$0xf]  ;;  %v2449_v28 = vld [vmem:[#allocation6 + $0xa4] sm:$0xf] }
  0x1c   :  { %v2483_v27 = vld [vmem:[#allocation6 + $0x1ac] sm:$0xf0]  ;;  %500 = vmatpush.bf16.msra.mxu0 %v1760_v16  ;;  %v1744_v29 = vor.u32 %v2451_v24, %v1743_v23  ;;  %v1745_v30 = vld [vmem:[#allocation6 + $0xb0] sm:$0xf0]  ;;  %v2481_v31 = vld [vmem:[#allocation6 + $0x1a4] sm:$0xf] }
  0x1d   :  { %v1873_v32 = vld [vmem:[#allocation6 + $0x1b0] sm:$0xf0]  ;;  %513 = vmatpush.bf16.msra.mxu1 %v1888_v17  ;;  %v1872_v33 = vor.u32 %v2483_v27, %v1871_v26  ;;  %v1748_v34 = vor.u32 %v2449_v28, %v1745_v30  ;;  %v1727_v35 = vld [vmem:[#allocation6 + $0x80] sm:$0xf]  ;;  %v2447_v36 = vld [vmem:[#allocation6 + $0x8c] sm:$0xf0] }
  0x1e   :  { %526 = vmatpush.bf16.msra.mxu2 %v1764_v21  ;;  %v1855_v37 = vld [vmem:[#allocation6 + $0x180] sm:$0xf]  ;;  %v1876_v38 = vor.u32 %v2481_v31, %v1873_v32  ;;  %v2479_v39 = vld [vmem:[#allocation6 + $0x18c] sm:$0xf0]  ;;  %v2445_v40 = vld [vmem:[#allocation6 + $0x84] sm:$0xf]  ;;  %v1728_v44 = vor.u32 %v2447_v36, %v1727_v35 }
  0x1f   :  { %539 = vmatpush.bf16.msra.mxu3 %v1892_v25  ;;  %v1729_v41 = vld [vmem:[#allocation6 + $0x90] sm:$0xf0]  ;;  %v2477_v42 = vld [vmem:[#allocation6 + $0x184] sm:$0xf]  ;;  %v1856_v45 = vor.u32 %v2479_v39, %v1855_v37  ;;  %v1711_v47 = vld [vmem:[#allocation6 + $0x60] sm:$0xf] }
  0x20   :  { %v1857_v43 = vld [vmem:[#allocation6 + $0x190] sm:$0xf0]  ;;  %501 = vmatpush.bf16.msra.mxu0 %v1744_v29  ;;  %v1732_v46 = vor.u32 %v2445_v40, %v1729_v41  ;;  %v2443_v48 = vld [vmem:[#allocation6 + $0x6c] sm:$0xf0]  ;;  %v1839_v49 = vld [vmem:[#allocation6 + $0x160] sm:$0xf] }
  0x21   :  { %514 = vmatpush.bf16.msra.mxu1 %v1872_v33  ;;  %v1860_v50 = vor.u32 %v2477_v42, %v1857_v43  ;;  %v2475_v51 = vld [vmem:[#allocation6 + $0x16c] sm:$0xf0]  ;;  %v2441_v52 = vld [vmem:[#allocation6 + $0x64] sm:$0xf]  ;;  %v1713_v53 = vld [vmem:[#allocation6 + $0x70] sm:$0xf0]  ;;  %v1712_v56 = vor.u32 %v2443_v48, %v1711_v47 }
  0x22   :  { %527 = vmatpush.bf16.msra.mxu2 %v1748_v34  ;;  %v2473_v54 = vld [vmem:[#allocation6 + $0x164] sm:$0xf]  ;;  %v1841_v55 = vld [vmem:[#allocation6 + $0x170] sm:$0xf0]  ;;  %v1840_v57 = vor.u32 %v2475_v51, %v1839_v49  ;;  %v1716_v58 = vor.u32 %v2441_v52, %v1713_v53  ;;  %v1695_v59 = vld [vmem:[#allocation6 + $0x40] sm:$0xf] }
  0x23   :  { %540 = vmatpush.bf16.msra.mxu3 %v1876_v38  ;;  %v2439_v60 = vld [vmem:[#allocation6 + $0x4c] sm:$0xf0]  ;;  %v1823_v61 = vld [vmem:[#allocation6 + $0x140] sm:$0xf]  ;;  %v1844_v62 = vor.u32 %v2473_v54, %v1841_v55  ;;  %v2437_v0 = vld [vmem:[#allocation6 + $0x44] sm:$0xf] }
  0x24   :  { %502 = vmatpush.bf16.msra.mxu0 %v1728_v44  ;;  %v2471_v63 = vld [vmem:[#allocation6 + $0x14c] sm:$0xf0]  ;;  %v1697_v1 = vld [vmem:[#allocation6 + $0x50] sm:$0xf0]  ;;  %v2469_v2 = vld [vmem:[#allocation6 + $0x144] sm:$0xf]  ;;  %v1696_v4 = vor.u32 %v2439_v60, %v1695_v59 }
  0x25   :  { %515 = vmatpush.bf16.msra.mxu1 %v1856_v45  ;;  %v1825_v3 = vld [vmem:[#allocation6 + $0x150] sm:$0xf0]  ;;  %v1824_v5 = vor.u32 %v2471_v63, %v1823_v61  ;;  %v1700_v6 = vor.u32 %v2437_v0, %v1697_v1  ;;  %v1679_v7 = vld [vmem:[#allocation6 + $0x20] sm:$0xf]  ;;  %v2435_v8 = vld [vmem:[#allocation6 + $0x2c] sm:$0xf0] }
  0x26   :  { %528 = vmatpush.bf16.msra.mxu2 %v1732_v46  ;;  %v1807_v9 = vld [vmem:[#allocation6 + $0x120] sm:$0xf]  ;;  %v1828_v10 = vor.u32 %v2469_v2, %v1825_v3  ;;  %v2467_v11 = vld [vmem:[#allocation6 + $0x12c] sm:$0xf0]  ;;  %v2433_v12 = vld [vmem:[#allocation6 + $0x24] sm:$0xf]  ;;  %v1680_v16 = vor.u32 %v2435_v8, %v1679_v7 }
  0x27   :  { %541 = vmatpush.bf16.msra.mxu3 %v1860_v50  ;;  %v1681_v13 = vld [vmem:[#allocation6 + $0x30] sm:$0xf0]  ;;  %v2465_v14 = vld [vmem:[#allocation6 + $0x124] sm:$0xf]  ;;  %v1663_v17 = vld [vmem:[#allocation6] sm:$0xf]  ;;  %v1808_v19 = vor.u32 %v2467_v11, %v1807_v9 }
  0x28   :  { %503 = vmatpush.bf16.msra.mxu0 %v1712_v56  ;;  %v1809_v15 = vld [vmem:[#allocation6 + $0x130] sm:$0xf0]  ;;  %v2431_v18 = vld [vmem:[#allocation6 + $0xc] sm:$0xf0]  ;;  %v1684_v20 = vor.u32 %v2433_v12, %v1681_v13  ;;  %v1791_v21 = vld [vmem:[#allocation6 + $0x100] sm:$0xf] }
  0x29   :  { %516 = vmatpush.bf16.msra.mxu1 %v1840_v57  ;;  %v2463_v22 = vld [vmem:[#allocation6 + $0x10c] sm:$0xf0]  ;;  %v2429_v23 = vld [vmem:[#allocation6 + $0x4] sm:$0xf]  ;;  %v1812_v24 = vor.u32 %v2465_v14, %v1809_v15  ;;  %v1665_v25 = vld [vmem:[#allocation6 + $0x10] sm:$0xf0]  ;;  %v1664_v31 = vor.u32 %v2431_v18, %v1663_v17 }
  0x2a   :  { %529 = vmatpush.bf16.msra.mxu2 %v1716_v58  ;;  %v2461_v26 = vld [vmem:[#allocation6 + $0x104] sm:$0xf]  ;;  %v1793_v27 = vld [vmem:[#allocation6 + $0x110] sm:$0xf0]  ;;  %v1783_v28 = vld [vmem:[#allocation6 + $0xe8] sm:$0xf]  ;;  %v1792_v35 = vor.u32 %v2463_v22, %v1791_v21  ;;  %v1668_v36 = vor.u32 %v2429_v23, %v1665_v25 }
  0x2b   :  { %542 = vmatpush.bf16.msra.mxu3 %v1844_v62  ;;  %v2460_v29 = vld [vmem:[#allocation6 + $0xf4] sm:$0xf0]  ;;  %v1911_v30 = vld [vmem:[#allocation6 + $0x1e8] sm:$0xf]  ;;  %v2458_v33 = vld [vmem:[#allocation6 + $0xec] sm:$0xf]  ;;  %v1796_v40 = vor.u32 %v2461_v26, %v1793_v27 }
  0x2c   :  { %504 = vmatpush.bf16.msra.mxu0 %v1696_v4  ;;  %v2492_v32 = vld [vmem:[#allocation6 + $0x1f4] sm:$0xf0]  ;;  %v1785_v34 = vld [vmem:[#allocation6 + $0xf8] sm:$0xf0]  ;;  %v2490_v37 = vld [vmem:[#allocation6 + $0x1ec] sm:$0xf]  ;;  %v1784_v41 = vor.u32 %v2460_v29, %v1783_v28 }
  0x2d   :  { %517 = vmatpush.bf16.msra.mxu1 %v1824_v5  ;;  %v1913_v38 = vld [vmem:[#allocation6 + $0x1f8] sm:$0xf0]  ;;  %v107_v39 = vld [vmem:[#allocation4] sm:$0xff]  ;;  %v1912_v43 = vor.u32 %v2492_v32, %v1911_v30  ;;  %v1788_v44 = vor.u32 %v2458_v33, %v1785_v34  ;;  %v1767_v45 = vld [vmem:[#allocation6 + $0xc8] sm:$0xf]  ;;  %vm1652_vm0 = vcmask 7168  }
  0x2e   :  { %530 = vmatpush.bf16.msra.mxu2 %v1700_v6  ;;  %v108_v42 = vld [vmem:[#allocation4 + $0x8] sm:$0xff]  ;;  %v1895_v47 = vld [vmem:[#allocation6 + $0x1c8] sm:$0xf]  ;;  %v1916_v48 = vor.u32 %v2490_v37, %v1913_v38  ;;  %v2816_v49 = vpack.c.bf16 %v107_v39, %v107_v39  ;;  %v2454_v51 = vld [vmem:[#allocation6 + $0xcc] sm:$0xf] }
  0x2f   :  { %543 = vmatpush.bf16.msra.mxu3 %v1828_v10  ;;  %v2456_v46 = vld [vmem:[#allocation6 + $0xd4] sm:$0xf0]  ;;  %v1769_v52 = vld [vmem:[#allocation6 + $0xd8] sm:$0xf0]  ;;  %v2818_v53 = vpack.c.bf16 %v108_v42, %v108_v42  ;;  %v2486_v54 = vld [vmem:[#allocation6 + $0x1cc] sm:$0xf] }
  0x30   :  { %505 = vmatpush.bf16.msra.mxu0 %v1680_v16  ;;  %v2488_v50 = vld [vmem:[#allocation6 + $0x1d4] sm:$0xf0]  ;;  %v1897_v55 = vld [vmem:[#allocation6 + $0x1d8] sm:$0xf0]  ;;  %v1768_v56 = vor.u32 %v2456_v46, %v1767_v45  ;;  %v1772_v58 = vor.u32 %v2454_v51, %v1769_v52  ;;  %v1751_v59 = vld [vmem:[#allocation6 + $0xa8] sm:$0xf] }
  0x31   :  { %518 = vmatpush.bf16.msra.mxu1 %v1808_v19  ;;  %v1896_v57 = vor.u32 %v2488_v50, %v1895_v47  ;;  %v2452_v60 = vld [vmem:[#allocation6 + $0xb4] sm:$0xf0]  ;;  %v1879_v61 = vld [vmem:[#allocation6 + $0x1a8] sm:$0xf]  ;;  %v1900_v62 = vor.u32 %v2486_v54, %v1897_v55  ;;  %v2450_v0 = vld [vmem:[#allocation6 + $0xac] sm:$0xf] }
  0x32   :  { %531 = vmatpush.bf16.msra.mxu2 %v1684_v20  ;;  %v2484_v63 = vld [vmem:[#allocation6 + $0x1b4] sm:$0xf0]  ;;  %v1753_v1 = vld [vmem:[#allocation6 + $0xb8] sm:$0xf0]  ;;  %v2482_v2 = vld [vmem:[#allocation6 + $0x1ac] sm:$0xf]  ;;  %v1752_v4 = vor.u32 %v2452_v60, %v1751_v59 }
  0x33   :  { %544 = vmatpush.bf16.msra.mxu3 %v1812_v24  ;;  %v1881_v3 = vld [vmem:[#allocation6 + $0x1b8] sm:$0xf0]  ;;  %v1880_v5 = vor.u32 %v2484_v63, %v1879_v61  ;;  %v1756_v6 = vor.u32 %v2450_v0, %v1753_v1  ;;  %v1735_v7 = vld [vmem:[#allocation6 + $0x88] sm:$0xf]  ;;  %v2448_v8 = vld [vmem:[#allocation6 + $0x94] sm:$0xf0] }
  0x34   :  { %506 = vmatpush.bf16.msra.mxu0 %v1664_v31  ;;  %v1863_v9 = vld [vmem:[#allocation6 + $0x188] sm:$0xf]  ;;  %v1884_v10 = vor.u32 %v2482_v2, %v1881_v3  ;;  %v2480_v11 = vld [vmem:[#allocation6 + $0x194] sm:$0xf0]  ;;  %v2446_v12 = vld [vmem:[#allocation6 + $0x8c] sm:$0xf]  ;;  %v1736_v16 = vor.u32 %v2448_v8, %v1735_v7 }
  0x35   :  { %519 = vmatpush.bf16.msra.mxu1 %v1792_v35  ;;  %v1737_v13 = vld [vmem:[#allocation6 + $0x98] sm:$0xf0]  ;;  %v2478_v14 = vld [vmem:[#allocation6 + $0x18c] sm:$0xf]  ;;  %v1864_v17 = vor.u32 %v2480_v11, %v1863_v9  ;;  %v1719_v19 = vld [vmem:[#allocation6 + $0x68] sm:$0xf] }
  0x36   :  { %532 = vmatpush.bf16.msra.mxu2 %v1668_v36  ;;  %v1865_v15 = vld [vmem:[#allocation6 + $0x198] sm:$0xf0]  ;;  %v1740_v18 = vor.u32 %v2446_v12, %v1737_v13  ;;  %v2444_v20 = vld [vmem:[#allocation6 + $0x74] sm:$0xf0]  ;;  %v1847_v21 = vld [vmem:[#allocation6 + $0x168] sm:$0xf] }
  0x37   :  { %545 = vmatpush.bf16.msra.mxu3 %v1796_v40  ;;  %507 = vmatmul.bf16.vlgmr.msra.gmra.mxu0 %v2816_v49  ;;  %v1868_v22 = vor.u32 %v2478_v14, %v1865_v15  ;;  %v2476_v23 = vld [vmem:[#allocation6 + $0x174] sm:$0xf0]  ;;  %v2442_v24 = vld [vmem:[#allocation6 + $0x6c] sm:$0xf]  ;;  %v1721_v25 = vld [vmem:[#allocation6 + $0x78] sm:$0xf0]  ;;  %v1720_v28 = vor.u32 %v2444_v20, %v1719_v19 }
  0x38   :  { %551 = vmatpush.bf16.msrb.mxu0 %v1784_v41  ;;  %520 = vmatmul.bf16.vlgmr.msra.gmra.mxu1 %v2818_v53  ;;  %v2474_v26 = vld [vmem:[#allocation6 + $0x16c] sm:$0xf]  ;;  %v1849_v27 = vld [vmem:[#allocation6 + $0x178] sm:$0xf0]  ;;  %v1848_v29 = vor.u32 %v2476_v23, %v1847_v21  ;;  %v1724_v30 = vor.u32 %v2442_v24, %v1721_v25  ;;  %v1703_v31 = vld [vmem:[#allocation6 + $0x48] sm:$0xf] }
  0x39   :  { %564 = vmatpush.bf16.msrb.mxu1 %v1912_v43  ;;  %533 = vmatmul.bf16.vlgmr.msra.gmra.mxu2 %v2816_v49  ;;  %v2440_v32 = vld [vmem:[#allocation6 + $0x54] sm:$0xf0]  ;;  %v1831_v33 = vld [vmem:[#allocation6 + $0x148] sm:$0xf]  ;;  %v1852_v34 = vor.u32 %v2474_v26, %v1849_v27  ;;  %v2438_v36 = vld [vmem:[#allocation6 + $0x4c] sm:$0xf] }
  0x3a   :  { %577 = vmatpush.bf16.msrb.mxu2 %v1788_v44  ;;  %546 = vmatmul.bf16.vlgmr.msra.gmra.mxu3 %v2818_v53  ;;  %v2472_v35 = vld [vmem:[#allocation6 + $0x154] sm:$0xf0]  ;;  %v1705_v37 = vld [vmem:[#allocation6 + $0x58] sm:$0xf0]  ;;  %v2470_v38 = vld [vmem:[#allocation6 + $0x14c] sm:$0xf]  ;;  %v1704_v40 = vor.u32 %v2440_v32, %v1703_v31 }
  0x3b   :  { %590 = vmatpush.bf16.msrb.mxu3 %v1916_v48  ;;  %v1833_v39 = vld [vmem:[#allocation6 + $0x158] sm:$0xf0]  ;;  %v1832_v41 = vor.u32 %v2472_v35, %v1831_v33  ;;  %v1708_v42 = vor.u32 %v2438_v36, %v1705_v37  ;;  %v1687_v43 = vld [vmem:[#allocation6 + $0x28] sm:$0xf]  ;;  %v2436_v44 = vld [vmem:[#allocation6 + $0x34] sm:$0xf0] }
  0x3c   :  { %552 = vmatpush.bf16.msrb.mxu0 %v1768_v56  ;;  %v1815_v45 = vld [vmem:[#allocation6 + $0x128] sm:$0xf]  ;;  %v1836_v46 = vor.u32 %v2470_v38, %v1833_v39  ;;  %v2468_v47 = vld [vmem:[#allocation6 + $0x134] sm:$0xf0]  ;;  %v2434_v48 = vld [vmem:[#allocation6 + $0x2c] sm:$0xf]  ;;  %v1688_v54 = vor.u32 %v2436_v44, %v1687_v43 }
  0x3d   :  { %565 = vmatpush.bf16.msrb.mxu1 %v1896_v57  ;;  %v1689_v50 = vld [vmem:[#allocation6 + $0x38] sm:$0xf0]  ;;  %v2466_v51 = vld [vmem:[#allocation6 + $0x12c] sm:$0xf]  ;;  %v1671_v55 = vld [vmem:[#allocation6 + $0x8] sm:$0xf]  ;;  %v1816_v56 = vor.u32 %v2468_v47, %v1815_v45 }
  0x3e   :  { %578 = vmatpush.bf16.msrb.mxu2 %v1772_v58  ;;  %v1817_v52 = vld [vmem:[#allocation6 + $0x138] sm:$0xf0]  ;;  %v1692_v57 = vor.u32 %v2434_v48, %v1689_v50  ;;  %v2432_v58 = vld [vmem:[#allocation6 + $0x14] sm:$0xf0]  ;;  %v1799_v59 = vld [vmem:[#allocation6 + $0x108] sm:$0xf] }
  0x3f   :  { %591 = vmatpush.bf16.msrb.mxu3 %v1900_v62  ;;  %v2464_v60 = vld [vmem:[#allocation6 + $0x114] sm:$0xf0]  ;;  %v1820_v61 = vor.u32 %v2466_v51, %v1817_v52  ;;  %v2430_v62 = vld [vmem:[#allocation6 + $0xc] sm:$0xf]  ;;  %v1673_v63 = vld [vmem:[#allocation6 + $0x18] sm:$0xf0] }
  0x40   :  { %553 = vmatpush.bf16.msrb.mxu0 %v1752_v4  ;;  %v2462_v0 = vld [vmem:[#allocation6 + $0x10c] sm:$0xf]  ;;  %v1801_v1 = vld [vmem:[#allocation6 + $0x118] sm:$0xf0]  ;;  %v2031_v2 = vld [vmem:[#allocation9 + $0xe0] sm:$0xf]  ;;  %v1672_v4 = vor.u32 %v2432_v58, %v1671_v55  ;;  %v1800_v7 = vor.u32 %v2464_v60, %v1799_v59  ;;  %v1676_v8 = vor.u32 %v2430_v62, %v1673_v63 }
  0x41   :  { %566 = vmatpush.bf16.msrb.mxu1 %v1880_v5  ;;  %v2523_v3 = vld [vmem:[#allocation9 + $0xec] sm:$0xf0]  ;;  %v2159_v5 = vld [vmem:[#allocation9 + $0x1e0] sm:$0xf]  ;;  %v1804_v9 = vor.u32 %v2462_v0, %v1801_v1 }
  0x42   :  { %579 = vmatpush.bf16.msrb.mxu2 %v1756_v6  ;;  %v2555_v6 = vld [vmem:[#allocation9 + $0x1ec] sm:$0xf0]  ;;  %v2287_v11 = vld [vmem:[#allocation9 + $0x2e0] sm:$0xf] }
  0x43   :  { %592 = vmatpush.bf16.msrb.mxu3 %v1884_v10  ;;  %v2032_v10 = vor.u32 %v2523_v3, %v2031_v2  ;;  %v2587_v12 = vld [vmem:[#allocation9 + $0x2ec] sm:$0xf0]  ;;  %v2015_v13 = vld [vmem:[#allocation9 + $0xc0] sm:$0xf]  ;;  %v2160_v15 = vor.u32 %v2555_v6, %v2159_v5 }
  0x44   :  { %554 = vmatpush.bf16.msrb.mxu0 %v1736_v16  ;;  %v2519_v14 = vld [vmem:[#allocation9 + $0xcc] sm:$0xf0]  ;;  %v2143_v16 = vld [vmem:[#allocation9 + $0x1c0] sm:$0xf] }
  0x45   :  { %567 = vmatpush.bf16.msrb.mxu1 %v1864_v17  ;;  %v2551_v17 = vld [vmem:[#allocation9 + $0x1cc] sm:$0xf0]  ;;  %v2016_v19 = vor.u32 %v2519_v14, %v2015_v13  ;;  %v2271_v20 = vld [vmem:[#allocation9 + $0x2c0] sm:$0xf]  ;;  %v2033_v14 = vld [vmem:[#allocation9 + $0xf0] sm:$0xf0] }
  0x46   :  { %580 = vmatpush.bf16.msrb.mxu2 %v1740_v18  ;;  %v2288_v18 = vor.u32 %v2587_v12, %v2287_v11  ;;  %v2583_v21 = vld [vmem:[#allocation9 + $0x2cc] sm:$0xf0]  ;;  %v2144_v24 = vor.u32 %v2551_v17, %v2143_v16  ;;  %v2415_v25 = vld [vmem:[#allocation9 + $0x3e0] sm:$0xf]  ;;  %v2521_v12 = vld [vmem:[#allocation9 + $0xe4] sm:$0xf] }
  0x47   :  { %593 = vmatpush.bf16.msrb.mxu3 %v1868_v22  ;;  %v1999_v22 = vld [vmem:[#allocation9 + $0xa0] sm:$0xf]  ;;  %v2515_v23 = vld [vmem:[#allocation9 + $0xac] sm:$0xf0]  ;;  %v2553_v17 = vld [vmem:[#allocation9 + $0x1e4] sm:$0xf] }
  0x48   :  { %555 = vmatpush.bf16.msrb.mxu0 %v1720_v28  ;;  %v2127_v26 = vld [vmem:[#allocation9 + $0x1a0] sm:$0xf]  ;;  %v2547_v27 = vld [vmem:[#allocation9 + $0x1ac] sm:$0xf0]  ;;  %v2000_v31 = vor.u32 %v2515_v23, %v1999_v22  ;;  %v2517_v22 = vld [vmem:[#allocation9 + $0xc4] sm:$0xf] }
  0x49   :  { %568 = vmatpush.bf16.msrb.mxu1 %v1848_v29  ;;  %v2619_v28 = vld [vmem:[#allocation9 + $0x3ec] sm:$0xf0]  ;;  %v2272_v29 = vor.u32 %v2583_v21, %v2271_v20  ;;  %v1983_v32 = vld [vmem:[#allocation9 + $0x80] sm:$0xf]  ;;  %v2128_v36 = vor.u32 %v2547_v27, %v2127_v26  ;;  %v2036_v20 = vor.u32 %v2521_v12, %v2033_v14  ;;  %v2017_v23 = vld [vmem:[#allocation9 + $0xd0] sm:$0xf0] }
  0x4a   :  { %581 = vmatpush.bf16.msrb.mxu2 %v1724_v30  ;;  %v2416_v30 = vor.u32 %v2619_v28, %v2415_v25  ;;  %v2255_v33 = vld [vmem:[#allocation9 + $0x2a0] sm:$0xf]  ;;  %v2511_v35 = vld [vmem:[#allocation9 + $0x8c] sm:$0xf0]  ;;  %v2549_v25 = vld [vmem:[#allocation9 + $0x1c4] sm:$0xf]  ;;  %v2020_v27 = vor.u32 %v2517_v22, %v2017_v23 }
  0x4b   :  { %594 = vmatpush.bf16.msrb.mxu3 %v1852_v34  ;;  %v2579_v34 = vld [vmem:[#allocation9 + $0x2ac] sm:$0xf0]  ;;  %v2399_v37 = vld [vmem:[#allocation9 + $0x3c0] sm:$0xf]  ;;  %v2145_v26 = vld [vmem:[#allocation9 + $0x1d0] sm:$0xf0] }
  0x4c   :  { %556 = vmatpush.bf16.msrb.mxu0 %v1704_v40  ;;  %v2615_v38 = vld [vmem:[#allocation9 + $0x3cc] sm:$0xf0]  ;;  %v2239_v43 = vld [vmem:[#allocation9 + $0x280] sm:$0xf]  ;;  %v2513_v28 = vld [vmem:[#allocation9 + $0xa4] sm:$0xf] }
  0x4d   :  { %569 = vmatpush.bf16.msrb.mxu1 %v1832_v41  ;;  %v2543_v39 = vld [vmem:[#allocation9 + $0x18c] sm:$0xf0]  ;;  %v2400_v40 = vor.u32 %v2615_v38, %v2399_v37  ;;  %v2256_v41 = vor.u32 %v2579_v34, %v2255_v33  ;;  %v2383_v47 = vld [vmem:[#allocation9 + $0x3a0] sm:$0xf]  ;;  %v2509_v34 = vld [vmem:[#allocation9 + $0x84] sm:$0xf] }
  0x4e   :  { %582 = vmatpush.bf16.msrb.mxu2 %v1708_v42  ;;  %v1967_v42 = vld [vmem:[#allocation9 + $0x60] sm:$0xf]  ;;  %v2575_v44 = vld [vmem:[#allocation9 + $0x28c] sm:$0xf0]  ;;  %v2541_v37 = vld [vmem:[#allocation9 + $0x184] sm:$0xf] }
  0x4f   :  { %595 = vmatpush.bf16.msrb.mxu3 %v1836_v46  ;;  %v2507_v45 = vld [vmem:[#allocation9 + $0x6c] sm:$0xf0]  ;;  %v2095_v50 = vld [vmem:[#allocation9 + $0x160] sm:$0xf]  ;;  %v2113_v38 = vld [vmem:[#allocation9 + $0x190] sm:$0xf0] }
  0x50   :  { %557 = vmatpush.bf16.msrb.mxu0 %v1688_v54  ;;  %v2611_v48 = vld [vmem:[#allocation9 + $0x3ac] sm:$0xf0]  ;;  %v2240_v54 = vor.u32 %v2575_v44, %v2239_v43  ;;  %v1968_v55 = vor.u32 %v2507_v45, %v1967_v42  ;;  %v2079_v63 = vld [vmem:[#allocation9 + $0x140] sm:$0xf]  ;;  %v2501_v44 = vld [vmem:[#allocation9 + $0x44] sm:$0xf] }
  0x51   :  { %570 = vmatpush.bf16.msrb.mxu1 %v1816_v56  ;;  %v2539_v51 = vld [vmem:[#allocation9 + $0x16c] sm:$0xf0]  ;;  %v2384_v52 = vor.u32 %v2611_v48, %v2383_v47  ;;  %v1951_v56 = vld [vmem:[#allocation9 + $0x40] sm:$0xf] }
  0x52   :  { %583 = vmatpush.bf16.msrb.mxu2 %v1692_v57  ;;  %v2223_v57 = vld [vmem:[#allocation9 + $0x260] sm:$0xf]  ;;  %v2571_v58 = vld [vmem:[#allocation9 + $0x26c] sm:$0xf0]  ;;  %v2096_v60 = vor.u32 %v2539_v51, %v2095_v50  ;;  %v2537_v51 = vld [vmem:[#allocation9 + $0x164] sm:$0xf] }
  0x53   :  { %596 = vmatpush.bf16.msrb.mxu3 %v1820_v61  ;;  %v2503_v59 = vld [vmem:[#allocation9 + $0x4c] sm:$0xf0]  ;;  %v2367_v61 = vld [vmem:[#allocation9 + $0x380] sm:$0xf]  ;;  %v2224_v2 = vor.u32 %v2571_v58, %v2223_v57 }
  0x54   :  { %558 = vmatpush.bf16.msrb.mxu0 %v1672_v4  ;;  %v2607_v62 = vld [vmem:[#allocation9 + $0x38c] sm:$0xf0]  ;;  %v1952_v3 = vor.u32 %v2503_v59, %v1951_v56  ;;  %v1935_v4 = vld [vmem:[#allocation9 + $0x20] sm:$0xf]  ;;  %v2497_v59 = vld [vmem:[#allocation9 + $0x24] sm:$0xf] }
  0x55   :  { %571 = vmatpush.bf16.msrb.mxu1 %v1800_v7  ;;  %v2535_v0 = vld [vmem:[#allocation9 + $0x14c] sm:$0xf0]  ;;  %v2368_v1 = vor.u32 %v2607_v62, %v2367_v61  ;;  %v2063_v7 = vld [vmem:[#allocation9 + $0x120] sm:$0xf] }
  0x56   :  { %584 = vmatpush.bf16.msrb.mxu2 %v1676_v8  ;;  %v2499_v5 = vld [vmem:[#allocation9 + $0x2c] sm:$0xf0]  ;;  %v2080_v6 = vor.u32 %v2535_v0, %v2079_v63  ;;  %v2207_v42 = vld [vmem:[#allocation9 + $0x240] sm:$0xf]  ;;  %v2533_v0 = vld [vmem:[#allocation9 + $0x144] sm:$0xf] }
  0x57   :  { %597 = vmatpush.bf16.msrb.mxu3 %v1804_v9  ;;  %559 = vmatmul.bf16.vlgmr.msrb.gmra.mxu0 %v2816_v49  ;;  %v2531_v8 = vld [vmem:[#allocation9 + $0x12c] sm:$0xf0]  ;;  %v1936_v9 = vor.u32 %v2499_v5, %v1935_v4  ;;  %v2351_v48 = vld [vmem:[#allocation9 + $0x360] sm:$0xf] }
  0x58   :  { %1418 = vmatpush.bf16.msra.mxu0 %v2032_v10  ;;  %572 = vmatmul.bf16.vlgmr.msrb.gmra.mxu1 %v2818_v53  ;;  %v1919_v10 = vld [vmem:[#allocation9] sm:$0xf]  ;;  %v2495_v11 = vld [vmem:[#allocation9 + $0xc] sm:$0xf0]  ;;  %v2064_v13 = vor.u32 %v2531_v8, %v2063_v7  ;;  %v1921_v8 = vld [vmem:[#allocation9 + $0x10] sm:$0xf0] }
  0x59   :  { %1431 = vmatpush.bf16.msra.mxu1 %v2160_v15  ;;  %585 = vmatmul.bf16.vlgmr.msrb.gmra.mxu2 %v2816_v49  ;;  %v2111_v49 = vld [vmem:[#allocation9 + $0x180] sm:$0xf]  ;;  %v2527_v16 = vld [vmem:[#allocation9 + $0x10c] sm:$0xf0] }
  0x5a   :  { %598 = vmatmul.bf16.vlgmr.msrb.gmra.mxu3 %v2818_v53  ;;  %1444 = vmatpush.bf16.msra.mxu2 %v2288_v18  ;;  %v1984_v53 = vor.u32 %v2511_v35, %v1983_v32  ;;  %v2112_v46 = vor.u32 %v2543_v39, %v2111_v49  ;;  %v2047_v15 = vld [vmem:[#allocation9 + $0x100] sm:$0xf]  ;;  %v2161_v18 = vld [vmem:[#allocation9 + $0x1f0] sm:$0xf0]  ;;  %v2505_v39 = vld [vmem:[#allocation9 + $0x64] sm:$0xf] }
  0x5b   :  { %1457 = vmatpush.bf16.msra.mxu3 %v2416_v30  ;;  %v2048_v21 = vor.u32 %v2527_v16, %v2047_v15  ;;  %v2148_v30 = vor.u32 %v2549_v25, %v2145_v26  ;;  %v2129_v32 = vld [vmem:[#allocation9 + $0x1b0] sm:$0xf0]  ;;  %v2567_v43 = vld [vmem:[#allocation9 + $0x24c] sm:$0xf0]  ;;  %v2191_v56 = vld [vmem:[#allocation9 + $0x220] sm:$0xf] }
  0x5c   :  { %1419 = vmatpush.bf16.msra.mxu0 %v2016_v19  ;;  %v1920_v19 = vor.u32 %v2495_v11, %v1919_v10  ;;  %v1985_v35 = vld [vmem:[#allocation9 + $0x90] sm:$0xf0]  ;;  %v2208_v45 = vor.u32 %v2567_v43, %v2207_v42  ;;  %v2603_v50 = vld [vmem:[#allocation9 + $0x36c] sm:$0xf0]  ;;  %v2335_v62 = vld [vmem:[#allocation9 + $0x340] sm:$0xf] }
  0x5d   :  { %1432 = vmatpush.bf16.msra.mxu1 %v2144_v24  ;;  %v2164_v24 = vor.u32 %v2553_v17, %v2161_v18  ;;  %v1988_v49 = vor.u32 %v2509_v34, %v1985_v35  ;;  %v2563_v57 = vld [vmem:[#allocation9 + $0x22c] sm:$0xf0]  ;;  %v2175_v4 = vld [vmem:[#allocation9 + $0x200] sm:$0xf]  ;;  %v2289_v10 = vld [vmem:[#allocation9 + $0x2f0] sm:$0xf0] }
  0x5e   :  { %1445 = vmatpush.bf16.msra.mxu2 %v2272_v29  ;;  %v2001_v29 = vld [vmem:[#allocation9 + $0xb0] sm:$0xf0]  ;;  %v2192_v58 = vor.u32 %v2563_v57, %v2191_v56  ;;  %v2599_v63 = vld [vmem:[#allocation9 + $0x34c] sm:$0xf0]  ;;  %v2529_v15 = vld [vmem:[#allocation9 + $0x124] sm:$0xf] }
  0x5f   :  { %1458 = vmatpush.bf16.msra.mxu3 %v2400_v40  ;;  %v2004_v33 = vor.u32 %v2513_v28, %v2001_v29  ;;  %v1969_v40 = vld [vmem:[#allocation9 + $0x70] sm:$0xf0]  ;;  %v2559_v5 = vld [vmem:[#allocation9 + $0x20c] sm:$0xf0]  ;;  %v2303_v22 = vld [vmem:[#allocation9 + $0x300] sm:$0xf] }
  0x60   :  { %1420 = vmatpush.bf16.msra.mxu0 %v2000_v31  ;;  %v2545_v31 = vld [vmem:[#allocation9 + $0x1a4] sm:$0xf]  ;;  %v2176_v7 = vor.u32 %v2559_v5, %v2175_v4  ;;  %v2595_v14 = vld [vmem:[#allocation9 + $0x32c] sm:$0xf0]  ;;  %v2065_v17 = vld [vmem:[#allocation9 + $0x130] sm:$0xf0] }
  0x61   :  { %1433 = vmatpush.bf16.msra.mxu1 %v2128_v36  ;;  %v2132_v36 = vor.u32 %v2545_v31, %v2129_v32  ;;  %v2068_v18 = vor.u32 %v2529_v15, %v2065_v17  ;;  %v2591_v23 = vld [vmem:[#allocation9 + $0x30c] sm:$0xf0]  ;;  %v2525_v25 = vld [vmem:[#allocation9 + $0x104] sm:$0xf]  ;;  %v2049_v26 = vld [vmem:[#allocation9 + $0x110] sm:$0xf0] }
  0x62   :  { %1446 = vmatpush.bf16.msra.mxu2 %v2256_v41  ;;  %v2116_v41 = vor.u32 %v2541_v37, %v2113_v38  ;;  %v2052_v28 = vor.u32 %v2525_v25, %v2049_v26  ;;  %v2417_v29 = vld [vmem:[#allocation9 + $0x3f0] sm:$0xf0]  ;;  %v2577_v31 = vld [vmem:[#allocation9 + $0x2a4] sm:$0xf]  ;;  %v2520_v15 = vld [vmem:[#allocation9 + $0xd4] sm:$0xf0] }
  0x63   :  { %1459 = vmatpush.bf16.msra.mxu3 %v2384_v52  ;;  %v2352_v52 = vor.u32 %v2603_v50, %v2351_v48  ;;  %v2257_v32 = vld [vmem:[#allocation9 + $0x2b0] sm:$0xf0]  ;;  %v2613_v34 = vld [vmem:[#allocation9 + $0x3c4] sm:$0xf]  ;;  %v2556_v25 = vld [vmem:[#allocation9 + $0x1f4] sm:$0xf0] }
  0x64   :  { %1421 = vmatpush.bf16.msra.mxu0 %v1984_v53  ;;  %v1972_v53 = vor.u32 %v2505_v39, %v1969_v40  ;;  %v2401_v35 = vld [vmem:[#allocation9 + $0x3d0] sm:$0xf0]  ;;  %v2573_v37 = vld [vmem:[#allocation9 + $0x284] sm:$0xf] }
  0x65   :  { %1434 = vmatpush.bf16.msra.mxu1 %v2112_v46  ;;  %v1953_v46 = vld [vmem:[#allocation9 + $0x50] sm:$0xf0]  ;;  %v2609_v39 = vld [vmem:[#allocation9 + $0x3a4] sm:$0xf] }
  0x66   :  { %1447 = vmatpush.bf16.msra.mxu2 %v2240_v54  ;;  %v1956_v47 = vor.u32 %v2501_v44, %v1953_v46  ;;  %v2097_v54 = vld [vmem:[#allocation9 + $0x170] sm:$0xf0]  ;;  %v2605_v44 = vld [vmem:[#allocation9 + $0x384] sm:$0xf] }
  0x67   :  { %1460 = vmatpush.bf16.msra.mxu3 %v2368_v1  ;;  %v2336_v1 = vor.u32 %v2599_v63, %v2335_v62  ;;  %v2241_v38 = vld [vmem:[#allocation9 + $0x290] sm:$0xf0]  ;;  %v2565_v48 = vld [vmem:[#allocation9 + $0x244] sm:$0xf] }
  0x68   :  { %1422 = vmatpush.bf16.msra.mxu0 %v1968_v55  ;;  %v2100_v55 = vor.u32 %v2537_v51, %v2097_v54  ;;  %v2385_v40 = vld [vmem:[#allocation9 + $0x3b0] sm:$0xf0]  ;;  %v2597_v63 = vld [vmem:[#allocation9 + $0x344] sm:$0xf] }
  0x69   :  { %1435 = vmatpush.bf16.msra.mxu1 %v2096_v60  ;;  %v1937_v60 = vld [vmem:[#allocation9 + $0x30] sm:$0xf0]  ;;  %v2557_v5 = vld [vmem:[#allocation9 + $0x204] sm:$0xf] }
  0x6a   :  { %1448 = vmatpush.bf16.msra.mxu2 %v2224_v2  ;;  %v1940_v61 = vor.u32 %v2497_v59, %v1937_v60  ;;  %v2081_v2 = vld [vmem:[#allocation9 + $0x150] sm:$0xf0]  ;;  %v2561_v59 = vld [vmem:[#allocation9 + $0x224] sm:$0xf] }
  0x6b   :  { %1461 = vmatpush.bf16.msra.mxu3 %v2352_v52  ;;  %v2225_v42 = vld [vmem:[#allocation9 + $0x270] sm:$0xf0]  ;;  %v2601_v52 = vld [vmem:[#allocation9 + $0x364] sm:$0xf] }
  0x6c   :  { %1423 = vmatpush.bf16.msra.mxu0 %v1952_v3  ;;  %v2084_v3 = vor.u32 %v2533_v0, %v2081_v2  ;;  %v2209_v50 = vld [vmem:[#allocation9 + $0x250] sm:$0xf0]  ;;  %v2039_v2 = vld [vmem:[#allocation9 + $0xe8] sm:$0xf]  ;;  %v2593_v17 = vld [vmem:[#allocation9 + $0x324] sm:$0xf] }
  0x6d   :  { %1436 = vmatpush.bf16.msra.mxu1 %v2080_v6  ;;  %v2493_v6 = vld [vmem:[#allocation9 + $0x4] sm:$0xf]  ;;  %v2212_v51 = vor.u32 %v2565_v48, %v2209_v50  ;;  %v2353_v54 = vld [vmem:[#allocation9 + $0x370] sm:$0xf0]  ;;  %v2119_v48 = vld [vmem:[#allocation9 + $0x188] sm:$0xf] }
  0x6e   :  { %1449 = vmatpush.bf16.msra.mxu2 %v2208_v45  ;;  %v1924_v11 = vor.u32 %v2493_v6, %v1921_v8  ;;  %v2369_v45 = vld [vmem:[#allocation9 + $0x390] sm:$0xf0]  ;;  %v2356_v57 = vor.u32 %v2601_v52, %v2353_v54  ;;  %v2589_v26 = vld [vmem:[#allocation9 + $0x304] sm:$0xf]  ;;  %v2544_v50 = vld [vmem:[#allocation9 + $0x194] sm:$0xf0] }
  0x6f   :  { %1462 = vmatpush.bf16.msra.mxu3 %v2336_v1  ;;  %v2372_v46 = vor.u32 %v2605_v44, %v2369_v45  ;;  %v2193_v60 = vld [vmem:[#allocation9 + $0x230] sm:$0xf0]  ;;  %v2508_v44 = vld [vmem:[#allocation9 + $0x74] sm:$0xf0]  ;;  %v2120_v54 = vor.u32 %v2544_v50, %v2119_v48 }
  0x70   :  { %1424 = vmatpush.bf16.msra.mxu0 %v1936_v9  ;;  %v2585_v9 = vld [vmem:[#allocation9 + $0x2e4] sm:$0xf]  ;;  %v2196_v62 = vor.u32 %v2561_v59, %v2193_v60  ;;  %v2337_v0 = vld [vmem:[#allocation9 + $0x350] sm:$0xf0]  ;;  %v2504_v52 = vld [vmem:[#allocation9 + $0x54] sm:$0xf0] }
  0x71   :  { %1437 = vmatpush.bf16.msra.mxu1 %v2064_v13  ;;  %v2292_v12 = vor.u32 %v2585_v9, %v2289_v10  ;;  %v2319_v13 = vld [vmem:[#allocation9 + $0x320] sm:$0xf]  ;;  %v2340_v4 = vor.u32 %v2597_v63, %v2337_v0  ;;  %v2177_v6 = vld [vmem:[#allocation9 + $0x210] sm:$0xf0]  ;;  %v2500_v59 = vld [vmem:[#allocation9 + $0x34] sm:$0xf0] }
  0x72   :  { %1450 = vmatpush.bf16.msra.mxu2 %v2192_v58  ;;  %v2320_v16 = vor.u32 %v2595_v14, %v2319_v13  ;;  %v2180_v8 = vor.u32 %v2557_v5, %v2177_v6  ;;  %v2496_v5 = vld [vmem:[#allocation9 + $0x14] sm:$0xf0]  ;;  %v2295_v6 = vld [vmem:[#allocation9 + $0x2e8] sm:$0xf] }
  0x73   :  { %v2616_v48 = vld [vmem:[#allocation9 + $0x3d4] sm:$0xf0] }
  0x74   :  { %1425 = vmatpush.bf16.msra.mxu0 %v1920_v19  ;;  %v2581_v19 = vld [vmem:[#allocation9 + $0x2c4] sm:$0xf]  ;;  %1463 = vmatpush.bf16.msra.mxu3 %v2320_v16 }
  0x75   :  { %1438 = vmatpush.bf16.msra.mxu1 %v2048_v21 }
  0x76   :  { %1451 = vmatpush.bf16.msra.mxu2 %v2176_v7 }
  0x78   :  { %1470 = vmatpush.bf16.msrb.mxu0 %v2036_v20  ;;  %v2273_v20 = vld [vmem:[#allocation9 + $0x2d0] sm:$0xf0] }
  0x79   :  { %1483 = vmatpush.bf16.msrb.mxu1 %v2164_v24  ;;  %v2276_v21 = vor.u32 %v2581_v19, %v2273_v20  ;;  %v2304_v24 = vor.u32 %v2591_v23, %v2303_v22  ;;  %v2167_v22 = vld [vmem:[#allocation9 + $0x1e8] sm:$0xf] }
  0x7a   :  { %1496 = vmatpush.bf16.msrb.mxu2 %v2292_v12  ;;  %v2023_v12 = vld [vmem:[#allocation9 + $0xc8] sm:$0xf] }
  0x7b   :  { %1464 = vmatpush.bf16.msra.mxu3 %v2304_v24  ;;  %v2024_v24 = vor.u32 %v2520_v15, %v2023_v12  ;;  %v2071_v15 = vld [vmem:[#allocation9 + $0x128] sm:$0xf] }
  0x7c   :  { %1471 = vmatpush.bf16.msrb.mxu0 %v2020_v27  ;;  %v2617_v27 = vld [vmem:[#allocation9 + $0x3e4] sm:$0xf] }
  0x7d   :  { %1484 = vmatpush.bf16.msrb.mxu1 %v2148_v30  ;;  %v2420_v30 = vor.u32 %v2617_v27, %v2417_v29  ;;  %v2305_v27 = vld [vmem:[#allocation9 + $0x310] sm:$0xf0]  ;;  %v2516_v29 = vld [vmem:[#allocation9 + $0xb4] sm:$0xf0] }
  0x7e   :  { %1497 = vmatpush.bf16.msrb.mxu2 %v2276_v21 }
  0x7f   :  { %1509 = vmatpush.bf16.msrb.mxu3 %v2420_v30  ;;  %v2308_v30 = vor.u32 %v2589_v26, %v2305_v27  ;;  %v2518_v26 = vld [vmem:[#allocation9 + $0xcc] sm:$0xf]  ;;  %v2025_v27 = vld [vmem:[#allocation9 + $0xd8] sm:$0xf0] }
  0x80   :  { %1472 = vmatpush.bf16.msrb.mxu0 %v2004_v33  ;;  %v2260_v33 = vor.u32 %v2577_v31, %v2257_v32  ;;  %v2168_v32 = vor.u32 %v2556_v25, %v2167_v22  ;;  %v2584_v25 = vld [vmem:[#allocation9 + $0x2d4] sm:$0xf0] }
  0x81   :  { %1485 = vmatpush.bf16.msrb.mxu1 %v2132_v36  ;;  %v2404_v36 = vor.u32 %v2613_v34, %v2401_v35 }
  0x82   :  { %1498 = vmatpush.bf16.msrb.mxu2 %v2260_v33 }
  0x83   :  { %1510 = vmatpush.bf16.msrb.mxu3 %v2404_v36  ;;  %v2151_v36 = vld [vmem:[#allocation9 + $0x1c8] sm:$0xf] }
  0x84   :  { %1473 = vmatpush.bf16.msrb.mxu0 %v1988_v49  ;;  %v2244_v49 = vor.u32 %v2573_v37, %v2241_v38  ;;  %v2552_v37 = vld [vmem:[#allocation9 + $0x1d4] sm:$0xf0] }
  0x85   :  { %1486 = vmatpush.bf16.msrb.mxu1 %v2116_v41  ;;  %v2388_v41 = vor.u32 %v2609_v39, %v2385_v40  ;;  %v2512_v39 = vld [vmem:[#allocation9 + $0x94] sm:$0xf0]  ;;  %v2152_v40 = vor.u32 %v2552_v37, %v2151_v36  ;;  %v2028_v37 = vor.u32 %v2518_v26, %v2025_v27  ;;  %v2359_v26 = vld [vmem:[#allocation9 + $0x368] sm:$0xf] }
  0x86   :  { %1499 = vmatpush.bf16.msrb.mxu2 %v2244_v49  ;;  %v1991_v49 = vld [vmem:[#allocation9 + $0x88] sm:$0xf] }
  0x87   :  { %1511 = vmatpush.bf16.msrb.mxu3 %v2388_v41  ;;  %v1992_v41 = vor.u32 %v2512_v39, %v1991_v49  ;;  %v2169_v49 = vld [vmem:[#allocation9 + $0x1f8] sm:$0xf0]  ;;  %v2263_v39 = vld [vmem:[#allocation9 + $0x2a8] sm:$0xf] }
  0x88   :  { %1474 = vmatpush.bf16.msrb.mxu0 %v1972_v53  ;;  %v2569_v53 = vld [vmem:[#allocation9 + $0x264] sm:$0xf] }
  0x89   :  { %1487 = vmatpush.bf16.msrb.mxu1 %v2100_v55  ;;  %v2228_v43 = vor.u32 %v2569_v53, %v2225_v42  ;;  %v2135_v53 = vld [vmem:[#allocation9 + $0x1a8] sm:$0xf]  ;;  %v2548_v42 = vld [vmem:[#allocation9 + $0x1b4] sm:$0xf0] }
  0x8a   :  { %v2136_v45 = vor.u32 %v2548_v42, %v2135_v53  ;;  %v2009_v53 = vld [vmem:[#allocation9 + $0xb8] sm:$0xf0] }
  0x8b   :  { %1500 = vmatpush.bf16.msrb.mxu2 %v2228_v43  ;;  %1512 = vmatpush.bf16.msrb.mxu3 %v2372_v46  ;;  %v1975_v43 = vld [vmem:[#allocation9 + $0x68] sm:$0xf] }
  0x8c   :  { %1475 = vmatpush.bf16.msrb.mxu0 %v1956_v47  ;;  %v2828_v47 = vld [vmem:[#allocation8] sm:$0xf]  ;;  %v1976_v46 = vor.u32 %v2508_v44, %v1975_v43 }
  0x8d   :  { %1488 = vmatpush.bf16.msrb.mxu1 %v2084_v3  ;;  %v620_v56 = vperm.slane %v2828_v47, 0  ;;  %v2524_v3 = vld [vmem:[#allocation9 + $0xf4] sm:$0xf0]  ;;  %v621_v10 = vperm.slane %v2828_v47, 1 }
  0x8f   :  { %1501 = vmatpush.bf16.msrb.mxu2 %v2212_v51  ;;  %1513 = vmatpush.bf16.msrb.mxu3 %v2356_v57  ;;  %v1959_v51 = vld [vmem:[#allocation9 + $0x48] sm:$0xf]  ;;  %v2540_v57 = vld [vmem:[#allocation9 + $0x174] sm:$0xf0] }
  0x90   :  { %1476 = vmatpush.bf16.msrb.mxu0 %v1940_v61 }
  0x91   :  { %1489 = vmatpush.bf16.msrb.mxu1 %v2068_v18  ;;  %v2321_v18 = vld [vmem:[#allocation9 + $0x330] sm:$0xf0] }
  0x92   :  { %v2324_v21 = vor.u32 %v2593_v17, %v2321_v18  ;;  %v623_v18 = vperm.slane %v2828_v47, 3 }
  0x93   :  { %1502 = vmatpush.bf16.msrb.mxu2 %v2196_v62  ;;  %1514 = vmatpush.bf16.msrb.mxu3 %v2340_v4  ;;  %v1927_v4 = vld [vmem:[#allocation9 + $0x8] sm:$0xf] }
  0x94   :  { %1477 = vmatpush.bf16.msrb.mxu0 %v1924_v11  ;;  %v2040_v11 = vor.u32 %v2524_v3, %v2039_v2  ;;  %v2087_v2 = vld [vmem:[#allocation9 + $0x148] sm:$0xf]  ;;  %v2536_v3 = vld [vmem:[#allocation9 + $0x154] sm:$0xf0] }
  0x95   :  { %1490 = vmatpush.bf16.msrb.mxu1 %v2052_v28  ;;  %v2007_v28 = vld [vmem:[#allocation9 + $0xa8] sm:$0xf] }
  0x96   :  { %v2008_v34 = vor.u32 %v2516_v29, %v2007_v28 }
  0x97   :  { %1503 = vmatpush.bf16.msrb.mxu2 %v2180_v8  ;;  %1515 = vmatpush.bf16.msrb.mxu3 %v2324_v21  ;;  %v2588_v8 = vld [vmem:[#allocation9 + $0x2f4] sm:$0xf0]  ;;  %v2279_v21 = vld [vmem:[#allocation9 + $0x2c8] sm:$0xf] }
  0x98   :  { %v2280_v36 = vor.u32 %v2584_v25, %v2279_v21  ;;  %v2215_v21 = vld [vmem:[#allocation9 + $0x248] sm:$0xf] }
  0x9b   :  { %1516 = vmatpush.bf16.msrb.mxu3 %v2308_v30 }
  0xb4   :  { %v508_v55 = vpop.f32.mrf.mxu0 }
  0xb5   :  { %v521_v58 = vpop.f32.mrf.mxu1 }
  0xb6   :  { %v522_v61 = vadd.f32 %v521_v58, %v508_v55  ;;  %v1960_v55 = vor.u32 %v2504_v52, %v1959_v51  ;;  %v1943_v58 = vld [vmem:[#allocation9 + $0x28] sm:$0xf] }
  0xb8   :  { %v628_v1 = vadd.f32 %v620_v56, %v522_v61  ;;  %v2103_v56 = vld [vmem:[#allocation9 + $0x168] sm:$0xf]  ;;  %v622_v61 = vperm.slane %v2828_v47, 2 }
  0xb9   :  { %v2104_v63 = vor.u32 %v2540_v57, %v2103_v56  ;;  %v2423_v47 = vld [vmem:[#allocation9 + $0x3e8] sm:$0xf]  ;;  %v2153_v56 = vld [vmem:[#allocation9 + $0x1d8] sm:$0xf0] }
  0xba   :  { %v632_v7 = vmax.f32 %v628_v1, 0.0  ;;  %v1944_v1 = vor.u32 %v2500_v59, %v1943_v58  ;;  %v2247_v57 = vld [vmem:[#allocation9 + $0x288] sm:$0xf]  ;;  %v2576_v59 = vld [vmem:[#allocation9 + $0x294] sm:$0xf0] }
  0xbc   :  { %v534_v9 = vpop.f32.mrf.mxu2  ;;  %v2832_v13 = vpack.c.bf16 %v632_v7, %v632_v7  ;;  %v510_v16 = vpop.f32.mrf.mxu0 }
  0xbd   :  { %v547_v14 = vpop.f32.mrf.mxu3  ;;  %v523_v20 = vpop.f32.mrf.mxu1  ;;  %v2532_v16 = vld [vmem:[#allocation9 + $0x134] sm:$0xf0] }
  0xbe   :  { %v548_v19 = vadd.f32 %v547_v14, %v534_v9  ;;  %1426 = vmatmul.bf16.vlgmr.msra.gmra.mxu0 %v2832_v13  ;;  %v2522_v9 = vld [vmem:[#allocation9 + $0xec] sm:$0xf]  ;;  %v1928_v14 = vor.u32 %v2496_v5, %v1927_v4  ;;  %v2072_v30 = vor.u32 %v2532_v16, %v2071_v15  ;;  %v2137_v5 = vld [vmem:[#allocation9 + $0x1b8] sm:$0xf0]  ;;  %v2608_v15 = vld [vmem:[#allocation9 + $0x394] sm:$0xf0] }
  0xbf   :  { %1522 = vmatpush.bf16.msra.mxu0 %v2040_v11  ;;  %v2088_v11 = vor.u32 %v2536_v3, %v2087_v2  ;;  %v2612_v3 = vld [vmem:[#allocation9 + $0x3b4] sm:$0xf0]  ;;  %v2546_v4 = vld [vmem:[#allocation9 + $0x1ac] sm:$0xf] }
  0xc0   :  { %v629_v23 = vadd.f32 %v621_v10, %v548_v19  ;;  %v2041_v10 = vld [vmem:[#allocation9 + $0xf8] sm:$0xf0]  ;;  %v2296_v19 = vor.u32 %v2588_v8, %v2295_v6  ;;  %v2506_v6 = vld [vmem:[#allocation9 + $0x6c] sm:$0xf]  ;;  %v2231_v8 = vld [vmem:[#allocation9 + $0x268] sm:$0xf] }
  0xc1   :  { %v2044_v20 = vor.u32 %v2522_v9, %v2041_v10  ;;  %v2572_v9 = vld [vmem:[#allocation9 + $0x274] sm:$0xf0]  ;;  %v2542_v16 = vld [vmem:[#allocation9 + $0x18c] sm:$0xf] }
  0xc2   :  { %v633_v31 = vmax.f32 %v629_v23, 0.0 }
  0xc3   :  { %1523 = vmatpush.bf16.msra.mxu0 %v2024_v24 }
  0xc4   :  { %v2835_v33 = vpack.c.bf16 %v633_v31, %v633_v31  ;;  %v536_v35 = vpop.f32.mrf.mxu2  ;;  %v2055_v31 = vld [vmem:[#allocation9 + $0x108] sm:$0xf] }
  0xc5   :  { %v549_v38 = vpop.f32.mrf.mxu3 }
  0xc6   :  { %1439 = vmatmul.bf16.vlgmr.msra.gmra.mxu1 %v2835_v33  ;;  %v2554_v38 = vld [vmem:[#allocation9 + $0x1ec] sm:$0xf] }
  0xc7   :  { %1535 = vmatpush.bf16.msra.mxu1 %v2168_v32  ;;  %1524 = vmatpush.bf16.msra.mxu0 %v2008_v34  ;;  %v2528_v32 = vld [vmem:[#allocation9 + $0x114] sm:$0xf0] }
  0xc8   :  { %v2620_v34 = vld [vmem:[#allocation9 + $0x3f4] sm:$0xf0]  ;;  %v2056_v43 = vor.u32 %v2528_v32, %v2055_v31  ;;  %v2498_v32 = vld [vmem:[#allocation9 + $0x2c] sm:$0xf] }
  0xc9   :  { %v2424_v44 = vor.u32 %v2620_v34, %v2423_v47  ;;  %v1945_v47 = vld [vmem:[#allocation9 + $0x38] sm:$0xf0]  ;;  %v2199_v34 = vld [vmem:[#allocation9 + $0x228] sm:$0xf] }
  0xcb   :  { %1536 = vmatpush.bf16.msra.mxu1 %v2152_v40  ;;  %1525 = vmatpush.bf16.msra.mxu0 %v1992_v41  ;;  %v2580_v40 = vld [vmem:[#allocation9 + $0x2b4] sm:$0xf0]  ;;  %v2514_v41 = vld [vmem:[#allocation9 + $0xac] sm:$0xf] }
  0xcc   :  { %v2264_v52 = vor.u32 %v2580_v40, %v2263_v39  ;;  %v2600_v39 = vld [vmem:[#allocation9 + $0x354] sm:$0xf0]  ;;  %v2534_v40 = vld [vmem:[#allocation9 + $0x14c] sm:$0xf] }
  0xce   :  { %1478 = vmatmul.bf16.vlgmr.msrb.gmra.mxu0 %v2832_v13 }
  0xcf   :  { %1537 = vmatpush.bf16.msra.mxu1 %v2136_v45  ;;  %1526 = vmatpush.bf16.msra.mxu0 %v1976_v46  ;;  %v2172_v45 = vor.u32 %v2554_v38, %v2169_v49  ;;  %v2407_v46 = vld [vmem:[#allocation9 + $0x3c8] sm:$0xf]  ;;  %v1948_v49 = vor.u32 %v2498_v32, %v1945_v47  ;;  %v2602_v32 = vld [vmem:[#allocation9 + $0x36c] sm:$0xf]  ;;  %v2361_v47 = vld [vmem:[#allocation9 + $0x378] sm:$0xf0] }
  0xd0   :  { %v2343_v38 = vld [vmem:[#allocation9 + $0x348] sm:$0xf] }
  0xd3   :  { %1538 = vmatpush.bf16.msra.mxu1 %v2120_v54  ;;  %1527 = vmatpush.bf16.msra.mxu0 %v1960_v55  ;;  %v2012_v54 = vor.u32 %v2514_v41, %v2009_v53  ;;  %v2550_v55 = vld [vmem:[#allocation9 + $0x1cc] sm:$0xf]  ;;  %v2089_v41 = vld [vmem:[#allocation9 + $0x158] sm:$0xf0] }
  0xd4   :  { %v560_v60 = vpop.f32.mrf.mxu0 }
  0xd5   :  { %v573_v62 = vpop.f32.mrf.mxu1 }
  0xd6   :  { %v574_v0 = vadd.f32 %v573_v62, %v560_v60  ;;  %1491 = vmatmul.bf16.vlgmr.msrb.gmra.mxu1 %v2835_v33  ;;  %v2510_v60 = vld [vmem:[#allocation9 + $0x8c] sm:$0xf]  ;;  %v2408_v62 = vor.u32 %v2616_v48, %v2407_v46  ;;  %v2344_v46 = vor.u32 %v2600_v39, %v2343_v38  ;;  %v2092_v48 = vor.u32 %v2534_v40, %v2089_v41  ;;  %v2345_v38 = vld [vmem:[#allocation9 + $0x358] sm:$0xf0] }
  0xd7   :  { %1539 = vmatpush.bf16.msra.mxu1 %v2104_v63  ;;  %1528 = vmatpush.bf16.msra.mxu0 %v1944_v1  ;;  %v2156_v63 = vor.u32 %v2550_v55, %v2153_v56  ;;  %v2248_v1 = vor.u32 %v2576_v59, %v2247_v57  ;;  %v2596_v56 = vld [vmem:[#allocation9 + $0x334] sm:$0xf0]  ;;  %v2530_v57 = vld [vmem:[#allocation9 + $0x12c] sm:$0xf]  ;;  %v2185_v40 = vld [vmem:[#allocation9 + $0x218] sm:$0xf0] }
  0xd8   :  { %v630_v7 = vadd.f32 %v622_v61, %v574_v0  ;;  %v1993_v61 = vld [vmem:[#allocation9 + $0x98] sm:$0xf0]  ;;  %v2391_v0 = vld [vmem:[#allocation9 + $0x3a8] sm:$0xf]  ;;  %v2558_v39 = vld [vmem:[#allocation9 + $0x20c] sm:$0xf] }
  0xd9   :  { %v1996_v2 = vor.u32 %v2510_v60, %v1993_v61  ;;  %v2392_v10 = vor.u32 %v2612_v3, %v2391_v0  ;;  %v2281_v0 = vld [vmem:[#allocation9 + $0x2d8] sm:$0xf0]  ;;  %v2526_v3 = vld [vmem:[#allocation9 + $0x10c] sm:$0xf] }
  0xda   :  { %v634_v12 = vmax.f32 %v630_v7, 0.0  ;;  %v1977_v7 = vld [vmem:[#allocation9 + $0x78] sm:$0xf0] }
  0xdb   :  { %1540 = vmatpush.bf16.msra.mxu1 %v2088_v11  ;;  %1529 = vmatpush.bf16.msra.mxu0 %v1928_v14  ;;  %v2140_v11 = vor.u32 %v2546_v4, %v2137_v5  ;;  %v1980_v14 = vor.u32 %v2506_v6, %v1977_v7  ;;  %v2057_v4 = vld [vmem:[#allocation9 + $0x118] sm:$0xf0]  ;;  %v2618_v5 = vld [vmem:[#allocation9 + $0x3ec] sm:$0xf] }
  0xdc   :  { %v586_v17 = vpop.f32.mrf.mxu2  ;;  %v2842_v22 = vpack.c.bf16 %v634_v12, %v634_v12  ;;  %v562_v24 = vpop.f32.mrf.mxu0  ;;  %v2375_v12 = vld [vmem:[#allocation9 + $0x388] sm:$0xf]  ;;  %v2425_v6 = vld [vmem:[#allocation9 + $0x3f8] sm:$0xf0] }
  0xdd   :  { %v599_v23 = vpop.f32.mrf.mxu3  ;;  %v575_v29 = vpop.f32.mrf.mxu1  ;;  %v2376_v24 = vor.u32 %v2608_v15, %v2375_v12  ;;  %v2428_v12 = vor.u32 %v2618_v5, %v2425_v6  ;;  %v2409_v15 = vld [vmem:[#allocation9 + $0x3d8] sm:$0xf0] }
  0xde   :  { %v600_v28 = vadd.f32 %v599_v23, %v586_v17  ;;  %1452 = vmatmul.bf16.vlgmr.msra.gmra.mxu2 %v2842_v22  ;;  %1530 = vmatmul.bf16.vlgmr.msra.gmra.mxu0 %v2832_v13  ;;  %v2121_v17 = vld [vmem:[#allocation9 + $0x198] sm:$0xf0]  ;;  %v2568_v23 = vld [vmem:[#allocation9 + $0x254] sm:$0xf0]  ;;  %v2538_v29 = vld [vmem:[#allocation9 + $0x16c] sm:$0xf] }
  0xdf   :  { %1548 = vmatpush.bf16.msra.mxu2 %v2296_v19  ;;  %1574 = vmatpush.bf16.msrb.mxu0 %v2044_v20  ;;  %v2502_v19 = vld [vmem:[#allocation9 + $0x4c] sm:$0xf]  ;;  %v1961_v20 = vld [vmem:[#allocation9 + $0x58] sm:$0xf0]  ;;  %v2124_v25 = vor.u32 %v2542_v16, %v2121_v17  ;;  %v2216_v31 = vor.u32 %v2568_v23, %v2215_v21 }
  0xe0   :  { %v631_v35 = vadd.f32 %v623_v18, %v600_v28  ;;  %1541 = vmatpush.bf16.msra.mxu1 %v2072_v30  ;;  %v2232_v18 = vor.u32 %v2572_v9, %v2231_v8  ;;  %v1964_v27 = vor.u32 %v2502_v19, %v1961_v20  ;;  %v2604_v28 = vld [vmem:[#allocation9 + $0x374] sm:$0xf0]  ;;  %v2105_v30 = vld [vmem:[#allocation9 + $0x178] sm:$0xf0]  ;;  %v2060_v9 = vor.u32 %v2526_v3, %v2057_v4  ;;  %v2574_v17 = vld [vmem:[#allocation9 + $0x28c] sm:$0xf] }
  0xe1   :  { %v2610_v20 = vld [vmem:[#allocation9 + $0x3ac] sm:$0xf]  ;;  %v2393_v21 = vld [vmem:[#allocation9 + $0x3b8] sm:$0xf0] }
  0xe2   :  { %v635_v42 = vmax.f32 %v631_v35, 0.0  ;;  %v2564_v35 = vld [vmem:[#allocation9 + $0x234] sm:$0xf0] }
  0xe3   :  { %1549 = vmatpush.bf16.msra.mxu2 %v2280_v36  ;;  %1575 = vmatpush.bf16.msrb.mxu0 %v2028_v37  ;;  %v2360_v36 = vor.u32 %v2604_v28, %v2359_v26  ;;  %v2108_v37 = vor.u32 %v2538_v29, %v2105_v30  ;;  %v2200_v53 = vor.u32 %v2564_v35, %v2199_v34  ;;  %v2606_v26 = vld [vmem:[#allocation9 + $0x38c] sm:$0xf]  ;;  %v2217_v30 = vld [vmem:[#allocation9 + $0x258] sm:$0xf0] }
  0xe4   :  { %v2846_v50 = vpack.c.bf16 %v635_v42, %v635_v42  ;;  %v588_v51 = vpop.f32.mrf.mxu2  ;;  %1542 = vmatpush.bf16.msra.mxu1 %v2056_v43  ;;  %v2494_v42 = vld [vmem:[#allocation9 + $0xc] sm:$0xf]  ;;  %v1929_v43 = vld [vmem:[#allocation9 + $0x18] sm:$0xf0] }
  0xe5   :  { %v601_v58 = vpop.f32.mrf.mxu3  ;;  %v2586_v51 = vld [vmem:[#allocation9 + $0x2ec] sm:$0xf]  ;;  %v1932_v55 = vor.u32 %v2494_v42, %v1929_v43  ;;  %v2201_v35 = vld [vmem:[#allocation9 + $0x238] sm:$0xf0]  ;;  %v2188_v43 = vor.u32 %v2558_v39, %v2185_v40 }
  0xe6   :  { %1465 = vmatmul.bf16.vlgmr.msra.gmra.mxu3 %v2846_v50  ;;  %v2073_v58 = vld [vmem:[#allocation9 + $0x138] sm:$0xf0]  ;;  %v2566_v29 = vld [vmem:[#allocation9 + $0x24c] sm:$0xf] }
  0xe7   :  { %1561 = vmatpush.bf16.msra.mxu3 %v2424_v44  ;;  %1550 = vmatpush.bf16.msra.mxu2 %v2264_v52  ;;  %v2183_v44 = vld [vmem:[#allocation9 + $0x208] sm:$0xf]  ;;  %v2297_v52 = vld [vmem:[#allocation9 + $0x2f8] sm:$0xf0]  ;;  %v2562_v34 = vld [vmem:[#allocation9 + $0x22c] sm:$0xf] }
  0xe8   :  { %1587 = vmatpush.bf16.msrb.mxu1 %v2172_v45  ;;  %1576 = vmatpush.bf16.msrb.mxu0 %v2012_v54  ;;  %v2560_v45 = vld [vmem:[#allocation9 + $0x214] sm:$0xf0]  ;;  %v2327_v54 = vld [vmem:[#allocation9 + $0x328] sm:$0xf]  ;;  %v2300_v60 = vor.u32 %v2586_v51, %v2297_v52  ;;  %v2329_v42 = vld [vmem:[#allocation9 + $0x338] sm:$0xf0] }
  0xe9   :  { %1543 = vmatmul.bf16.vlgmr.msra.gmra.mxu1 %v2835_v33  ;;  %v2184_v59 = vor.u32 %v2560_v45, %v2183_v44  ;;  %v2328_v61 = vor.u32 %v2596_v56, %v2327_v54  ;;  %v2590_v45 = vld [vmem:[#allocation9 + $0x30c] sm:$0xf] }
  0xea   :  { %v768_v51 = vld [vmem:[%s2871_s4] sm:$0xf] }
  0xeb   :  { %1562 = vmatpush.bf16.msra.mxu3 %v2408_v62  ;;  %1551 = vmatpush.bf16.msra.mxu2 %v2248_v1  ;;  %v2076_v62 = vor.u32 %v2530_v57, %v2073_v58  ;;  %v2311_v1 = vld [vmem:[#allocation9 + $0x308] sm:$0xf]  ;;  %v770_v52 = vperm.slane %v768_v51, 0 }
  0xec   :  { %1588 = vmatpush.bf16.msrb.mxu1 %v2156_v63  ;;  %1577 = vmatpush.bf16.msrb.mxu0 %v1996_v2  ;;  %v2582_v63 = vld [vmem:[#allocation9 + $0x2cc] sm:$0xf]  ;;  %v2592_v2 = vld [vmem:[#allocation9 + $0x314] sm:$0xf0] }
  0xed   :  { %v2284_v7 = vor.u32 %v2582_v63, %v2281_v0  ;;  %v2312_v8 = vor.u32 %v2592_v2, %v2311_v1 }
  0xee   :  { %1504 = vmatmul.bf16.vlgmr.msrb.gmra.mxu2 %v2842_v22 }
  0xef   :  { %1563 = vmatpush.bf16.msra.mxu3 %v2392_v10  ;;  %1552 = vmatpush.bf16.msra.mxu2 %v2232_v18  ;;  %v2578_v10 = vld [vmem:[#allocation9 + $0x2ac] sm:$0xf]  ;;  %v2249_v18 = vld [vmem:[#allocation9 + $0x298] sm:$0xf0] }
  0xf0   :  { %1589 = vmatpush.bf16.msrb.mxu1 %v2140_v11  ;;  %1578 = vmatpush.bf16.msrb.mxu0 %v1980_v14  ;;  %v2265_v11 = vld [vmem:[#allocation9 + $0x2b8] sm:$0xf0]  ;;  %v2614_v14 = vld [vmem:[#allocation9 + $0x3cc] sm:$0xf]  ;;  %v2252_v23 = vor.u32 %v2574_v17, %v2249_v18 }
  0xf1   :  { %v2268_v16 = vor.u32 %v2578_v10, %v2265_v11  ;;  %v2412_v19 = vor.u32 %v2614_v14, %v2409_v15 }
  0xf3   :  { %1564 = vmatpush.bf16.msra.mxu3 %v2376_v24  ;;  %1553 = vmatpush.bf16.msra.mxu2 %v2216_v31  ;;  %v2233_v24 = vld [vmem:[#allocation9 + $0x278] sm:$0xf0] }
  0xf4   :  { %1590 = vmatpush.bf16.msrb.mxu1 %v2124_v25  ;;  %1579 = vmatpush.bf16.msrb.mxu0 %v1964_v27  ;;  %v2396_v25 = vor.u32 %v2610_v20, %v2393_v21  ;;  %v2377_v27 = vld [vmem:[#allocation9 + $0x398] sm:$0xf0] }
  0xf5   :  { %v2380_v31 = vor.u32 %v2606_v26, %v2377_v27 }
  0xf6   :  { %1517 = vmatmul.bf16.vlgmr.msrb.gmra.mxu3 %v2846_v50 }
  0xf7   :  { %1565 = vmatpush.bf16.msra.mxu3 %v2360_v36  ;;  %1554 = vmatpush.bf16.msra.mxu2 %v2200_v53  ;;  %v2364_v36 = vor.u32 %v2602_v32, %v2361_v47  ;;  %v2594_v53 = vld [vmem:[#allocation9 + $0x32c] sm:$0xf] }
  0xf8   :  { %1591 = vmatpush.bf16.msrb.mxu1 %v2108_v37  ;;  %1580 = vmatpush.bf16.msrb.mxu0 %v1948_v49  ;;  %v2598_v37 = vld [vmem:[#allocation9 + $0x34c] sm:$0xf]  ;;  %v2204_v49 = vor.u32 %v2562_v34, %v2201_v35  ;;  %v2332_v44 = vor.u32 %v2594_v53, %v2329_v42 }
  0xf9   :  { %v2348_v41 = vor.u32 %v2598_v37, %v2345_v38 }
  0xfb   :  { %1566 = vmatpush.bf16.msra.mxu3 %v2344_v46  ;;  %1555 = vmatpush.bf16.msra.mxu2 %v2184_v59  ;;  %v2313_v46 = vld [vmem:[#allocation9 + $0x318] sm:$0xf0] }
  0xfc   :  { %1592 = vmatpush.bf16.msrb.mxu1 %v2092_v48  ;;  %1581 = vmatpush.bf16.msrb.mxu0 %v1932_v55  ;;  %v2316_v48 = vor.u32 %v2590_v45, %v2313_v46 }
  0xfe   :  { %1556 = vmatmul.bf16.vlgmr.msra.gmra.mxu2 %v2842_v22 }
  0xff   :  { %1600 = vmatpush.bf16.msrb.mxu2 %v2300_v60  ;;  %1567 = vmatpush.bf16.msra.mxu3 %v2328_v61  ;;  %v771_v61 = vperm.slane %v768_v51, 1 }
 0x100   :  { %1593 = vmatpush.bf16.msrb.mxu1 %v2076_v62  ;;  %1582 = vmatmul.bf16.vlgmr.msrb.gmra.mxu0 %v2832_v13  ;;  %v2570_v13 = vld [vmem:[#allocation9 + $0x26c] sm:$0xf] }
 0x101   :  { %v2236_v28 = vor.u32 %v2570_v13, %v2233_v24 }
 0x103   :  { %1601 = vmatpush.bf16.msrb.mxu2 %v2284_v7  ;;  %1568 = vmatpush.bf16.msra.mxu3 %v2312_v8 }
 0x104   :  { %1594 = vmatpush.bf16.msrb.mxu1 %v2060_v9 }
 0x106   :  { %1569 = vmatmul.bf16.vlgmr.msra.gmra.mxu3 %v2846_v50 }
 0x107   :  { %1613 = vmatpush.bf16.msrb.mxu3 %v2428_v12  ;;  %1595 = vmatmul.bf16.vlgmr.msrb.gmra.mxu1 %v2835_v33  ;;  %v2220_v33 = vor.u32 %v2566_v29, %v2217_v30  ;;  %v1630_v12 = vld [vmem:[#allocation11] sm:$0xf] }
 0x108   :  { %1602 = vmatpush.bf16.msrb.mxu2 %v2268_v16  ;;  %v1632_v17 = vperm.slane %v1630_v12, 0  ;;  %v1634_v53 = vperm.slane %v1630_v12, 2  ;;  %v1635_v46 = vperm.slane %v1630_v12, 3 }
 0x10b   :  { %1614 = vmatpush.bf16.msrb.mxu3 %v2412_v19  ;;  %v1633_v19 = vperm.slane %v1630_v12, 1 }
 0x10c   :  { %1603 = vmatpush.bf16.msrb.mxu2 %v2252_v23 }
 0x10f   :  { %1615 = vmatpush.bf16.msrb.mxu3 %v2396_v25 }
 0x110   :  { %1604 = vmatpush.bf16.msrb.mxu2 %v2236_v28 }
 0x113   :  { %1616 = vmatpush.bf16.msrb.mxu3 %v2380_v31 }
 0x114   :  { %1605 = vmatpush.bf16.msrb.mxu2 %v2220_v33  ;;  %v772_v33 = vperm.slane %v768_v51, 2 }
 0x117   :  { %1617 = vmatpush.bf16.msrb.mxu3 %v2364_v36  ;;  %v773_v36 = vperm.slane %v768_v51, 3  ;;  %v1650_v51 = vstv %s2873_s6 }
 0x118   :  { %1606 = vmatpush.bf16.msrb.mxu2 %v2204_v49 }
 0x11b   :  { %1618 = vmatpush.bf16.msrb.mxu3 %v2348_v41 }
 0x11c   :  { %1607 = vmatpush.bf16.msrb.mxu2 %v2188_v43 }
 0x11f   :  { %1619 = vmatpush.bf16.msrb.mxu3 %v2332_v44  ;;  %1608 = vmatmul.bf16.vlgmr.msrb.gmra.mxu2 %v2842_v22 }
 0x123   :  { %1620 = vmatpush.bf16.msrb.mxu3 %v2316_v48 }
 0x126   :  { %1621 = vmatmul.bf16.vlgmr.msrb.gmra.mxu3 %v2846_v50 }
 0x13b   :  { %v1427_v54 = vpop.f32.mrf.mxu0 }
 0x13c   :  { %v1428_v55 = vadd.f32 %v1427_v54, %v770_v52 }
 0x143   :  { %v1440_v56 = vpop.f32.mrf.mxu1  ;;  %v1429_v58 = vpop.f32.mrf.mxu0 }
 0x144   :  { %v1441_v57 = vadd.f32 %v1440_v56, %v1428_v55 }
 0x14b   :  { %v1442_v59 = vpop.f32.mrf.mxu1  ;;  %v1479_v60 = vpop.f32.mrf.mxu0 }
 0x14c   :  { %v1480_v62 = vadd.f32 %v1479_v60, %v771_v61 }
 0x153   :  { %v1492_v63 = vpop.f32.mrf.mxu1  ;;  %v1481_v22 = vpop.f32.mrf.mxu0 }
 0x154   :  { %v1493_v0 = vadd.f32 %v1492_v63, %v1480_v62 }
 0x15b   :  { %v1494_v1 = vpop.f32.mrf.mxu1  ;;  %v1531_v2 = vpop.f32.mrf.mxu0 }
 0x15c   :  { %v1532_v34 = vadd.f32 %v1531_v2, %v772_v33 }
 0x161   :  { %v1453_v50 = vpop.f32.mrf.mxu2 }
 0x162   :  { %v1454_v10 = vadd.f32 %v1453_v50, %v1441_v57 }
 0x163   :  { %v1533_v4 = vpop.f32.mrf.mxu0 }
 0x166   :  { %v1544_v3 = vpop.f32.mrf.mxu1 }
 0x167   :  { %v1545_v35 = vadd.f32 %v1544_v3, %v1532_v34 }
 0x169   :  { %v1466_v5 = vpop.f32.mrf.mxu3  ;;  %v1455_v6 = vpop.f32.mrf.mxu2 }
 0x16a   :  { %v1467_v11 = vadd.f32 %v1466_v5, %v1454_v10 }
 0x16c   :  { %v1626_v16 = vmax.f32 %v1467_v11, 0.0 }
 0x16e   :  { %v1546_v7 = vpop.f32.mrf.mxu1  ;;  %v1640_v13 = vmul.f32 %v1632_v17, %v1626_v16 }
 0x171   :  { %v1468_v8 = vpop.f32.mrf.mxu3  ;;  %v1505_v9 = vpop.f32.mrf.mxu2 }
 0x172   :  { %v1506_v14 = vadd.f32 %v1505_v9, %v1493_v0 }
 0x179   :  { %v1518_v15 = vpop.f32.mrf.mxu3  ;;  %v1507_v20 = vpop.f32.mrf.mxu2 }
 0x17a   :  { %v1519_v18 = vadd.f32 %v1518_v15, %v1506_v14 }
 0x17c   :  { %v1627_v21 = vmax.f32 %v1519_v18, 0.0 }
 0x17d   :  { %v1583_v23 = vpop.f32.mrf.mxu0 }
 0x17e   :  { %v1641_v24 = vmul.f32 %v1633_v19, %v1627_v21  ;;  %v1584_v39 = vadd.f32 %v1583_v23, %v773_v36 }
 0x180   :  { %v1644_v25 = vadd.f32 %v1641_v24, %v1640_v13 }
 0x181   :  { %v1520_v26 = vpop.f32.mrf.mxu3  ;;  %v1557_v28 = vpop.f32.mrf.mxu2 }
 0x182   :  { %v1558_v37 = vadd.f32 %v1557_v28, %v1545_v35 }
 0x184   :  { %v1596_v27 = vpop.f32.mrf.mxu1 }
 0x185   :  { %v1585_v29 = vpop.f32.mrf.mxu0  ;;  %v1597_v40 = vadd.f32 %v1596_v27, %v1584_v39 }
 0x189   :  { %v1570_v30 = vpop.f32.mrf.mxu3  ;;  %v1559_v32 = vpop.f32.mrf.mxu2 }
 0x18a   :  { %v1571_v38 = vadd.f32 %v1570_v30, %v1558_v37 }
 0x18c   :  { %v1598_v31 = vpop.f32.mrf.mxu1  ;;  %v1628_v41 = vmax.f32 %v1571_v38, 0.0 }
 0x18e   :  { %v1642_v44 = vmul.f32 %v1634_v53, %v1628_v41 }
 0x190   :  { %v1645_v55 = vadd.f32 %v1644_v25, %v1642_v44 }
 0x191   :  { %v1572_v47 = vpop.f32.mrf.mxu3 }
 0x1a2   :  { %v1609_v49 = vpop.f32.mrf.mxu2 }
 0x1a3   :  { %v1610_v42 = vadd.f32 %v1609_v49, %v1597_v40 }
 0x1a9   :  { %v1622_v43 = vpop.f32.mrf.mxu3 }
 0x1aa   :  { %v1623_v45 = vadd.f32 %v1622_v43, %v1610_v42  ;;  %v1611_v48 = vpop.f32.mrf.mxu2 }
 0x1ac   :  { %v1629_v52 = vmax.f32 %v1623_v45, 0.0 }
 0x1ae   :  { %v1643_v54 = vmul.f32 %v1635_v46, %v1629_v52 }
 0x1b0   :  { %v1646_v56 = vadd.f32 %v1645_v55, %v1643_v54 }
 0x1b1   :  { %v1624_v57 = vpop.f32.mrf.mxu3 }
 0x1b2   :  { %1647 = vadd.xlane.f32.xlu0 %v1646_v56 }
 0x225   :  { %v1648_v58 = vpop.xlane.xlu0 %1647 }
 0x226   :  { %v1651_v59 = vadd.f32 %v1650_v51, %v1648_v58 }
 0x228   :  { %1653 = vst.msk [vmem:[%s2874_s7] sm:$0xff] %vm1652_vm0, %v1651_v59 }
 0x229   :  { %1658 = vsyncpa [#allocation5], 1 }
 0x22a   :  { %1659 = vsyncpa [#allocation7], 1 }
 0x22b   :  { %1660 = vsyncpa [#allocation10], 1 }

</bundles_post_ra>
